<compile_context>
chip_gen: v7x
topology: tpu7x:2x2x1
jax: 0.10.0
libtpu: 0.0.40
codegen_flags: <defaults>
</compile_context>

<pallas_src>
import math

import numpy as np
import jax
import jax.numpy as jnp
from jax import lax
from jax.experimental import pallas as pl
from jax.experimental.pallas import tpu as pltpu

# ----- problem sizes (small, consistent with the module) -----
B = 2            # batch
L = 8            # num_patches / sequence length
D_MODEL = 32
NUM_HEADS = 4
D_ATTN = D_MODEL // 2          # split_ratio = 0.5
D_CONV = D_MODEL - D_ATTN
HEAD_DIM = D_ATTN // NUM_HEADS
EPS = 1e-6
LANES = 128                    # lane width of the parameter slab

_INV_SQRT2 = 0.7071067811865476


def _gelu(x):
    # exact (erf-based) GELU, matching nn.GELU() / F.gelu default
    return 0.5 * x * (1.0 + lax.erf(x * _INV_SQRT2))


def _layernorm(x, g, b):
    mu = jnp.mean(x, axis=-1, keepdims=True)
    var = jnp.mean((x - mu) ** 2, axis=-1, keepdims=True)
    return (x - mu) / jnp.sqrt(var + EPS) * g + b


# ---------------------------------------------------------------------------
# Host-side (numpy, one-time) parameter preprocessing + packing into ONE
# lane-dense bf16 slab.  Returns (slab, mat_offsets, vec_offsets).
# ---------------------------------------------------------------------------
def _prepare_slab(p, Bx, Lx):
    BL = Bx * Lx
    np_p = {k: np.asarray(v, np.float32) for k, v in p.items()}

    # fused conv taps: [w_m1; w_z; w_p1] row-stacked -> one matmul per conv
    c1w = np.concatenate([np_p["c1w"][0], np_p["c1w"][1], np_p["c1w"][2]], 0)
    c2w = np.concatenate([np_p["c2w"][0], np_p["c2w"][1], np_p["c2w"][2]], 0)

    # block-diagonal attention bias (queries only attend inside their own
    # batch element), tiled NUM_HEADS times along lanes for the fused scores
    row_b = np.arange(BL)[:, None] // Lx
    col_b = np.arange(BL)[None, :] // Lx
    bias = np.where(row_b == col_b, 0.0, -1e30).astype(np.float32)     # (BL,BL)
    bias_tiled = np.tile(bias, (1, NUM_HEADS))                          # (BL,H*BL)

    # per-head lane masks (H, D_ATTN)
    head_masks = np.zeros((NUM_HEADS, D_ATTN), np.float32)
    for h in range(NUM_HEADS):
        head_masks[h, h * HEAD_DIM:(h + 1) * HEAD_DIM] = 1.0

    # conv shift boundary masks (BL, 2):
    #   col 0: zero where i % L == 0      (no x[i-1] -> zero pad / batch edge)
    #   col 1: zero where i % L == L - 1  (no x[i+1])
    bmask = np.ones((BL, 2), np.float32)
    bmask[np.arange(BL) % Lx == 0, 0] = 0.0
    bmask[np.arange(BL) % Lx == Lx - 1, 1] = 0.0

    # all 1-row vectors (biases, LN gains) packed into one (rows, 128) block
    vec_names = ["b_pre", "g1", "be1", "bq", "bk", "bv", "bo",
                 "c1b", "c2b", "b_post", "g2", "be2", "b1", "b2"]
    vec_rows = ((len(vec_names) + 7) // 8) * 8
    vecs = np.zeros((vec_rows, LANES), np.float32)
    vec_off = {}
    for i, name in enumerate(vec_names):
        v = np_p[name].reshape(-1)
        vecs[i, :v.shape[0]] = v
        vec_off[name] = (i, v.shape[0])

    mats = {
        "w_pre": np_p["w_pre"],                       # (32, 32)
        "wq": np_p["wq"], "wk": np_p["wk"], "wv": np_p["wv"],  # (16, 16)
        "wo": np_p["wo"],                             # (16, 16)
        "c1w": c1w, "c2w": c2w,                       # (48, 16)
        # row-split w_post: branch concat becomes a sum of two matmuls
        "w_post_a": np_p["w_post"][:D_ATTN, :],       # (16, 32)
        "w_post_c": np_p["w_post"][D_ATTN:, :],       # (16, 32)
        "w1": np_p["w1"],                             # (32, 128) lane-dense
        "w2t": np_p["w2"].T,                          # (32, 128) lane-dense
        "bias_t": bias_tiled,                         # (BL, H*BL)
        "hmask": head_masks,                          # (H, D_ATTN)
        "bmask": bmask,                               # (BL, 2)
        "vecs": vecs,                                 # (16, 128)
    }

    offs, r = {}, 0
    for name, arr in mats.items():
        rows, cols = arr.shape
        offs[name] = (r, rows, cols)
        r += ((rows + 7) // 8) * 8                    # sublane-aligned blocks
    R = ((r + 7) // 8) * 8

    slab = np.zeros((R, LANES), np.float32)
    for name, arr in mats.items():
        r0, rows, cols = offs[name]
        slab[r0:r0 + rows, :cols] = arr
    return jnp.asarray(slab, jnp.bfloat16), offs, vec_off


# ---------------------------------------------------------------------------
# Pallas kernel: full TransformerLayer forward, whole batch in one invocation
# ---------------------------------------------------------------------------
def _make_kernel(offs, vec_off, Bx, Lx):
    BL = Bx * Lx
    scale = 1.0 / math.sqrt(HEAD_DIM)
    f32, bf16 = jnp.float32, jnp.bfloat16
    vec_r0 = offs["vecs"][0]

    def kernel(x_ref, slab_ref, o_ref):
        def W(name):                              # bf16 weight / constant view
            r0, rows, cols = offs[name]
            return slab_ref[r0:r0 + rows, :cols]

        def V(name):                              # (1, n) f32 bias / gain row
            row, n = vec_off[name]
            return slab_ref[vec_r0 + row:vec_r0 + row + 1, :n].astype(f32)

        def mm(a_f32, wname, bname=None):         # bf16 MXU matmul, f32 acc
            out = jnp.dot(a_f32.astype(bf16), W(wname),
                          preferred_element_type=f32)
            return out if bname is None else out + V(bname)

        x = x_ref[...].astype(f32)                                  # (BL, D)

        # ---- pre_split_fc + norm1 ----
        x_pre = mm(x, "w_pre", "b_pre")
        xn = _layernorm(x_pre, V("g1"), V("be1"))

        # ---- attention branch (fused heads) ----
        xa = xn[:, :D_ATTN]
        q = mm(xa, "wq", "bq")                                      # (BL, 16)
        k = mm(xa, "wk", "bk")
        v = mm(xa, "wv", "bv")

        hm = W("hmask").astype(f32)                                 # (H, 16)
        # sublane-stack masked K / V: (H*BL, D_ATTN); block h holds k*mask_h
        K_stack = jnp.concatenate(
            [k * hm[h:h + 1, :] for h in range(NUM_HEADS)], axis=0).astype(bf16)
        V_stack = jnp.concatenate(
            [v * hm[h:h + 1, :] for h in range(NUM_HEADS)], axis=0).astype(bf16)

        # all-head scores in ONE matmul: (BL, H*BL)
        s = lax.dot_general(q.astype(bf16), K_stack, (((1,), (1,)), ((), ())),
                            preferred_element_type=f32)
        s = s * scale + W("bias_t").astype(f32)
        # single row-wide max is valid: a per-row constant cancels per head
        s = s - jnp.max(s, axis=-1, keepdims=True)
        p = jnp.exp(s)

        # per-head denominators from lane-block sums, expanded to output lanes
        inv_expand = jnp.zeros((BL, D_ATTN), f32)
        for h in range(NUM_HEADS):
            l_h = jnp.sum(p[:, h * BL:(h + 1) * BL], axis=-1, keepdims=True)
            inv_expand = inv_expand + hm[h:h + 1, :] / l_h          # exact div

        attn = jnp.dot(p.astype(bf16), V_stack,
                       preferred_element_type=f32) * inv_expand     # (BL, 16)
        attn_out = mm(attn, "wo", "bo")

        # ---- conv branch: Conv1d(k=3,p=1) -> GELU -> Conv1d(k=3,p=1) -------
        xc = xn[:, D_ATTN:]
        bm = W("bmask").astype(f32)                                 # (BL, 2)
        m_m1, m_p1 = bm[:, 0:1], bm[:, 1:2]

        def conv1d(xin, wname, bname):
            # +/-1 sequence shift on the XLU; boundary/batch-edge zeros via
            # the precomputed mask (replaces the old shift-operator matmuls)
            x_m1 = pltpu.roll(xin, shift=1, axis=0) * m_m1          # x[i-1]
            x_p1 = pltpu.roll(xin, shift=BL - 1, axis=0) * m_p1     # x[i+1]
            xpack = jnp.concatenate([x_m1, xin, x_p1], axis=1)      # (BL, 3C)
            return mm(xpack, wname, bname)                          # fused taps

        c = conv1d(xc, "c1w", "c1b")
        c = _gelu(c)
        c = conv1d(c, "c2w", "c2b")

        # ---- merge branches (concat folded into row-split w_post), residual
        # straight-line acc + dot form (MRB-friendly on v7x)
        x_comb = jnp.dot(attn_out.astype(bf16), W("w_post_a"),
                         preferred_element_type=f32)
        x_comb = x_comb + jnp.dot(c.astype(bf16), W("w_post_c"),
                                  preferred_element_type=f32)
        x_comb = x_comb + V("b_post")
        x1 = x_pre + x_comb                                         # dropout1=id

        # ---- FFN ----
        ff_in = _layernorm(x1, V("g2"), V("be2"))
        h1 = _gelu(mm(ff_in, "w1", "b1"))
        # fc2 stored transposed (lane-dense); contract both lane dims
        ff = lax.dot_general(h1.astype(bf16), W("w2t"), (((1,), (1,)), ((), ())),
                             preferred_element_type=f32) + V("b2")  # dropouts=id
        # TODO(synk): output is 32 lanes wide (masked vst); negligible here.
        o_ref[...] = (x1 + ff).astype(o_ref.dtype)

    return kernel


# ---------------------------------------------------------------------------
# Factory: one-time packing + jitted apply (per-call path is a single call)
# ---------------------------------------------------------------------------
def make_transformer_layer(params, Bx, Lx):
    slab, offs, vec_off = _prepare_slab(params, Bx, Lx)
    kernel = _make_kernel(offs, vec_off, Bx, Lx)

    call = pl.pallas_call(
        kernel,
        out_shape=jax.ShapeDtypeStruct((Bx * Lx, D_MODEL), jnp.float32),
        in_specs=[pl.BlockSpec(memory_space=pltpu.MemorySpace.VMEM),
                  pl.BlockSpec(memory_space=pltpu.MemorySpace.VMEM)],
        out_specs=pl.BlockSpec(memory_space=pltpu.MemorySpace.VMEM),
    )

    @jax.jit
    def apply(x, slab_):
        x2d = x.reshape(Bx * Lx, D_MODEL)       # fold batch into the row axis
        return call(x2d, slab_).reshape(Bx, Lx, D_MODEL)

    return lambda x: apply(x, slab)


# ---------------------------------------------------------------------------
# Deterministic parameter init (synthetic; shapes follow the module __init__)
# ---------------------------------------------------------------------------
def init_params(key):
    ks = jax.random.split(key, 20)

    def w(k, shape, scale=0.1):
        return scale * jax.random.normal(k, shape, jnp.float32)

    return {
        "w_pre": w(ks[0], (D_MODEL, D_MODEL)),
        "b_pre": w(ks[1], (1, D_MODEL), 0.02),
        "g1": jnp.ones((1, D_MODEL), jnp.float32),
        "be1": jnp.zeros((1, D_MODEL), jnp.float32),
        "wq": w(ks[2], (D_ATTN, D_ATTN)),
        "bq": w(ks[3], (1, D_ATTN), 0.02),
        "wk": w(ks[4], (D_ATTN, D_ATTN)),
        "bk": w(ks[5], (1, D_ATTN), 0.02),
        "wv": w(ks[6], (D_ATTN, D_ATTN)),
        "bv": w(ks[7], (1, D_ATTN), 0.02),
        "wo": w(ks[8], (D_ATTN, D_ATTN)),
        "bo": w(ks[9], (1, D_ATTN), 0.02),
        "c1w": w(ks[10], (3, D_CONV, D_CONV)),
        "c1b": w(ks[11], (1, D_CONV), 0.02),
        "c2w": w(ks[12], (3, D_CONV, D_CONV)),
        "c2b": w(ks[13], (1, D_CONV), 0.02),
        "w_post": w(ks[14], (D_MODEL, D_MODEL)),
        "b_post": w(ks[15], (1, D_MODEL), 0.02),
        "g2": jnp.ones((1, D_MODEL), jnp.float32),
        "be2": jnp.zeros((1, D_MODEL), jnp.float32),
        "w1": w(ks[16], (D_MODEL, 4 * D_MODEL)),
        "b1": w(ks[17], (1, 4 * D_MODEL), 0.02),
        "w2": w(ks[18], (4 * D_MODEL, D_MODEL)),
        "b2": w(ks[19], (1, D_MODEL), 0.02),
    }


# ---------------------------------------------------------------------------
# Pure-JAX f32 reference (matches the PyTorch forward; sanity check only)
# ---------------------------------------------------------------------------
def reference(x, p):
    def ln(v, g, b):
        mu = jnp.mean(v, axis=-1, keepdims=True)
        var = jnp.mean((v - mu) ** 2, axis=-1, keepdims=True)
        return (v - mu) / jnp.sqrt(var + EPS) * g + b

    def gelu(v):
        return 0.5 * v * (1.0 + lax.erf(v / jnp.sqrt(2.0)))

    Bx, Lx, _ = x.shape
    x_pre = x @ p["w_pre"] + p["b_pre"]
    xn = ln(x_pre, p["g1"], p["be1"])
    xa, xc = xn[..., :D_ATTN], xn[..., D_ATTN:]

    q = (xa @ p["wq"] + p["bq"]).reshape(Bx, Lx, NUM_HEADS, HEAD_DIM)
    k = (xa @ p["wk"] + p["bk"]).reshape(Bx, Lx, NUM_HEADS, HEAD_DIM)
    v = (xa @ p["wv"] + p["bv"]).reshape(Bx, Lx, NUM_HEADS, HEAD_DIM)
    s = jnp.einsum("blhd,bmhd->bhlm", q, k) / math.sqrt(HEAD_DIM)
    a = jax.nn.softmax(s, axis=-1)
    o = jnp.einsum("bhlm,bmhd->blhd", a, v).reshape(Bx, Lx, D_ATTN)
    attn_out = o @ p["wo"] + p["bo"]

    def conv1d(xin, w3, b):
        xm1 = jnp.pad(xin, ((0, 0), (1, 0), (0, 0)))[:, :Lx, :]
        xp1 = jnp.pad(xin, ((0, 0), (0, 1), (0, 0)))[:, 1:, :]
        return xm1 @ w3[0] + xin @ w3[1] + xp1 @ w3[2] + b

    c = conv1d(xc, p["c1w"], p["c1b"])
    c = gelu(c)
    c = conv1d(c, p["c2w"], p["c2b"])

    comb = jnp.concatenate([attn_out, c], axis=-1)
    x1 = x_pre + (comb @ p["w_post"] + p["b_post"])
    ffin = ln(x1, p["g2"], p["be2"])
    ff = gelu(ffin @ p["w1"] + p["b1"]) @ p["w2"] + p["b2"]
    return x1 + ff


if __name__ == "__main__":
    key = jax.random.PRNGKey(0)
    kx, kp = jax.random.split(key)
    x = jax.random.normal(kx, (B, L, D_MODEL), jnp.float32)
    params = init_params(kp)

    layer = make_transformer_layer(params, B, L)      # one-time packing + jit
    out = jax.block_until_ready(layer(x))
    ref = jax.block_until_ready(reference(x, params))

    assert out.shape == (B, L, D_MODEL)
    err = float(jnp.max(jnp.abs(out - ref)))
    # bf16 MXU operands throughout (per perf review) vs an f32 reference:
    # expected max-abs error ~1e-2; 5e-2 leaves safe headroom.
    assert err < 5e-2, f"kernel vs reference mismatch: max abs err = {err}"
    print("KERNEL_OK")
</pallas_src>

<mosaic_0001>
module attributes {stable_mosaic.version = 11 : i64} {
  func.func @kernel(%arg0: memref<16x32xf32, #tpu.memory_space<vmem>>, %arg1: memref<344x128xbf16, #tpu.memory_space<vmem>>, %arg2: memref<16x32xf32, #tpu.memory_space<vmem>>) attributes {dimension_semantics = [], scalar_prefetch = 0 : i64, scratch_operands = 0 : i64, tpu.core_type = #tpu.core_type<tc>} {
    %c0 = arith.constant 0 : index
    %c0_0 = arith.constant 0 : index
    %0 = vector.load %arg0[%c0, %c0_0] : memref<16x32xf32, #tpu.memory_space<vmem>>, vector<16x32xf32>
    %1 = arith.truncf %0 : vector<16x32xf32> to vector<16x32xbf16>
    %c0_1 = arith.constant 0 : index
    %c0_2 = arith.constant 0 : index
    %2 = vector.load %arg1[%c0_1, %c0_2] : memref<344x128xbf16, #tpu.memory_space<vmem>>, vector<32x32xbf16>
    %cst = arith.constant dense<0.000000e+00> : vector<16x32xf32>
    %3 = tpu.matmul %1, %2, %cst {dimension_numbers = #tpu.dot_dimension_numbers<[1], [0], [0], [1], [0, 0, 1, 1], [], []>} : vector<16x32xbf16>, vector<32x32xbf16>, vector<16x32xf32> -> vector<16x32xf32>
    %c328 = arith.constant 328 : index
    %c0_3 = arith.constant 0 : index
    %4 = vector.load %arg1[%c328, %c0_3] : memref<344x128xbf16, #tpu.memory_space<vmem>>, vector<1x32xbf16>
    %5 = arith.extf %4 : vector<1x32xbf16> to vector<1x32xf32>
    %6 = vector.broadcast %5 : vector<1x32xf32> to vector<16x32xf32>
    %7 = arith.addf %3, %6 : vector<16x32xf32>
    %c329 = arith.constant 329 : index
    %c0_4 = arith.constant 0 : index
    %8 = vector.load %arg1[%c329, %c0_4] : memref<344x128xbf16, #tpu.memory_space<vmem>>, vector<1x32xbf16>
    %9 = arith.extf %8 : vector<1x32xbf16> to vector<1x32xf32>
    %c330 = arith.constant 330 : index
    %c0_5 = arith.constant 0 : index
    %10 = vector.load %arg1[%c330, %c0_5] : memref<344x128xbf16, #tpu.memory_space<vmem>>, vector<1x32xbf16>
    %11 = arith.extf %10 : vector<1x32xbf16> to vector<1x32xf32>
    %cst_6 = arith.constant dense<0.000000e+00> : vector<16xf32>
    %12 = vector.multi_reduction <add>, %7, %cst_6 [1] : vector<16x32xf32> to vector<16xf32>
    %13 = vector.shape_cast %12 : vector<16xf32> to vector<16x1xf32>
    %cst_7 = arith.constant 3.200000e+01 : f32
    %14 = vector.broadcast %cst_7 : f32 to vector<16x1xf32>
    %15 = arith.divf %13, %14 : vector<16x1xf32>
    %16 = vector.broadcast %15 : vector<16x1xf32> to vector<16x32xf32>
    %17 = arith.subf %7, %16 : vector<16x32xf32>
    %18 = arith.mulf %17, %17 : vector<16x32xf32>
    %cst_8 = arith.constant dense<0.000000e+00> : vector<16xf32>
    %19 = vector.multi_reduction <add>, %18, %cst_8 [1] : vector<16x32xf32> to vector<16xf32>
    %20 = vector.shape_cast %19 : vector<16xf32> to vector<16x1xf32>
    %cst_9 = arith.constant 3.200000e+01 : f32
    %21 = vector.broadcast %cst_9 : f32 to vector<16x1xf32>
    %22 = arith.divf %20, %21 : vector<16x1xf32>
    %23 = vector.broadcast %15 : vector<16x1xf32> to vector<16x32xf32>
    %24 = arith.subf %7, %23 : vector<16x32xf32>
    %cst_10 = arith.constant 9.99999997E-7 : f32
    %25 = vector.broadcast %cst_10 : f32 to vector<16x1xf32>
    %26 = arith.addf %22, %25 : vector<16x1xf32>
    %27 = math.sqrt %26 : vector<16x1xf32>
    %28 = vector.broadcast %27 : vector<16x1xf32> to vector<16x32xf32>
    %29 = arith.divf %24, %28 : vector<16x32xf32>
    %30 = vector.broadcast %9 : vector<1x32xf32> to vector<16x32xf32>
    %31 = arith.mulf %29, %30 : vector<16x32xf32>
    %32 = vector.broadcast %11 : vector<1x32xf32> to vector<16x32xf32>
    %33 = arith.addf %31, %32 : vector<16x32xf32>
    %34 = vector.extract_strided_slice %33 {offsets = [0, 0], sizes = [16, 16], strides = [1, 1]} : vector<16x32xf32> to vector<16x16xf32>
    %35 = arith.truncf %34 : vector<16x16xf32> to vector<16x16xbf16>
    %c32 = arith.constant 32 : index
    %c0_11 = arith.constant 0 : index
    %36 = vector.load %arg1[%c32, %c0_11] : memref<344x128xbf16, #tpu.memory_space<vmem>>, vector<16x16xbf16>
    %cst_12 = arith.constant dense<0.000000e+00> : vector<16x16xf32>
    %37 = tpu.matmul %35, %36, %cst_12 {dimension_numbers = #tpu.dot_dimension_numbers<[1], [0], [0], [1], [0, 0, 1, 1], [], []>} : vector<16x16xbf16>, vector<16x16xbf16>, vector<16x16xf32> -> vector<16x16xf32>
    %c331 = arith.constant 331 : index
    %c0_13 = arith.constant 0 : index
    %38 = vector.load %arg1[%c331, %c0_13] : memref<344x128xbf16, #tpu.memory_space<vmem>>, vector<1x16xbf16>
    %39 = arith.extf %38 : vector<1x16xbf16> to vector<1x16xf32>
    %40 = vector.broadcast %39 : vector<1x16xf32> to vector<16x16xf32>
    %41 = arith.addf %37, %40 : vector<16x16xf32>
    %42 = arith.truncf %34 : vector<16x16xf32> to vector<16x16xbf16>
    %c48 = arith.constant 48 : index
    %c0_14 = arith.constant 0 : index
    %43 = vector.load %arg1[%c48, %c0_14] : memref<344x128xbf16, #tpu.memory_space<vmem>>, vector<16x16xbf16>
    %cst_15 = arith.constant dense<0.000000e+00> : vector<16x16xf32>
    %44 = tpu.matmul %42, %43, %cst_15 {dimension_numbers = #tpu.dot_dimension_numbers<[1], [0], [0], [1], [0, 0, 1, 1], [], []>} : vector<16x16xbf16>, vector<16x16xbf16>, vector<16x16xf32> -> vector<16x16xf32>
    %c332 = arith.constant 332 : index
    %c0_16 = arith.constant 0 : index
    %45 = vector.load %arg1[%c332, %c0_16] : memref<344x128xbf16, #tpu.memory_space<vmem>>, vector<1x16xbf16>
    %46 = arith.extf %45 : vector<1x16xbf16> to vector<1x16xf32>
    %47 = vector.broadcast %46 : vector<1x16xf32> to vector<16x16xf32>
    %48 = arith.addf %44, %47 : vector<16x16xf32>
    %49 = arith.truncf %34 : vector<16x16xf32> to vector<16x16xbf16>
    %c64 = arith.constant 64 : index
    %c0_17 = arith.constant 0 : index
    %50 = vector.load %arg1[%c64, %c0_17] : memref<344x128xbf16, #tpu.memory_space<vmem>>, vector<16x16xbf16>
    %cst_18 = arith.constant dense<0.000000e+00> : vector<16x16xf32>
    %51 = tpu.matmul %49, %50, %cst_18 {dimension_numbers = #tpu.dot_dimension_numbers<[1], [0], [0], [1], [0, 0, 1, 1], [], []>} : vector<16x16xbf16>, vector<16x16xbf16>, vector<16x16xf32> -> vector<16x16xf32>
    %c333 = arith.constant 333 : index
    %c0_19 = arith.constant 0 : index
    %52 = vector.load %arg1[%c333, %c0_19] : memref<344x128xbf16, #tpu.memory_space<vmem>>, vector<1x16xbf16>
    %53 = arith.extf %52 : vector<1x16xbf16> to vector<1x16xf32>
    %54 = vector.broadcast %53 : vector<1x16xf32> to vector<16x16xf32>
    %55 = arith.addf %51, %54 : vector<16x16xf32>
    %c304 = arith.constant 304 : index
    %c0_20 = arith.constant 0 : index
    %56 = vector.load %arg1[%c304, %c0_20] : memref<344x128xbf16, #tpu.memory_space<vmem>>, vector<4x16xbf16>
    %57 = arith.extf %56 : vector<4x16xbf16> to vector<4x16xf32>
    %58 = vector.extract_strided_slice %57 {offsets = [0, 0], sizes = [1, 16], strides = [1, 1]} : vector<4x16xf32> to vector<1x16xf32>
    %59 = vector.broadcast %58 : vector<1x16xf32> to vector<16x16xf32>
    %60 = arith.mulf %48, %59 : vector<16x16xf32>
    %61 = vector.extract_strided_slice %57 {offsets = [1, 0], sizes = [1, 16], strides = [1, 1]} : vector<4x16xf32> to vector<1x16xf32>
    %62 = vector.broadcast %61 : vector<1x16xf32> to vector<16x16xf32>
    %63 = arith.mulf %48, %62 : vector<16x16xf32>
    %64 = vector.extract_strided_slice %57 {offsets = [2, 0], sizes = [1, 16], strides = [1, 1]} : vector<4x16xf32> to vector<1x16xf32>
    %65 = vector.broadcast %64 : vector<1x16xf32> to vector<16x16xf32>
    %66 = arith.mulf %48, %65 : vector<16x16xf32>
    %67 = vector.extract_strided_slice %57 {offsets = [3, 0], sizes = [1, 16], strides = [1, 1]} : vector<4x16xf32> to vector<1x16xf32>
    %68 = vector.broadcast %67 : vector<1x16xf32> to vector<16x16xf32>
    %69 = arith.mulf %48, %68 : vector<16x16xf32>
    %70 = tpu.concatenate %60, %63, %66, %69 in 0 : vector<16x16xf32>, vector<16x16xf32>, vector<16x16xf32>, vector<16x16xf32> -> vector<64x16xf32>
    %71 = arith.truncf %70 : vector<64x16xf32> to vector<64x16xbf16>
    %72 = vector.extract_strided_slice %57 {offsets = [0, 0], sizes = [1, 16], strides = [1, 1]} : vector<4x16xf32> to vector<1x16xf32>
    %73 = vector.broadcast %72 : vector<1x16xf32> to vector<16x16xf32>
    %74 = arith.mulf %55, %73 : vector<16x16xf32>
    %75 = vector.extract_strided_slice %57 {offsets = [1, 0], sizes = [1, 16], strides = [1, 1]} : vector<4x16xf32> to vector<1x16xf32>
    %76 = vector.broadcast %75 : vector<1x16xf32> to vector<16x16xf32>
    %77 = arith.mulf %55, %76 : vector<16x16xf32>
    %78 = vector.extract_strided_slice %57 {offsets = [2, 0], sizes = [1, 16], strides = [1, 1]} : vector<4x16xf32> to vector<1x16xf32>
    %79 = vector.broadcast %78 : vector<1x16xf32> to vector<16x16xf32>
    %80 = arith.mulf %55, %79 : vector<16x16xf32>
    %81 = vector.extract_strided_slice %57 {offsets = [3, 0], sizes = [1, 16], strides = [1, 1]} : vector<4x16xf32> to vector<1x16xf32>
    %82 = vector.broadcast %81 : vector<1x16xf32> to vector<16x16xf32>
    %83 = arith.mulf %55, %82 : vector<16x16xf32>
    %84 = tpu.concatenate %74, %77, %80, %83 in 0 : vector<16x16xf32>, vector<16x16xf32>, vector<16x16xf32>, vector<16x16xf32> -> vector<64x16xf32>
    %85 = arith.truncf %84 : vector<64x16xf32> to vector<64x16xbf16>
    %86 = arith.truncf %41 : vector<16x16xf32> to vector<16x16xbf16>
    %cst_21 = arith.constant dense<0.000000e+00> : vector<16x64xf32>
    %87 = tpu.matmul %86, %71, %cst_21 {dimension_numbers = #tpu.dot_dimension_numbers<[1], [1], [0], [0], [0, 0, 1, 0], [], []>} : vector<16x16xbf16>, vector<64x16xbf16>, vector<16x64xf32> -> vector<16x64xf32>
    %cst_22 = arith.constant 5.000000e-01 : f32
    %88 = vector.broadcast %cst_22 : f32 to vector<16x64xf32>
    %89 = arith.mulf %87, %88 : vector<16x64xf32>
    %c288 = arith.constant 288 : index
    %c0_23 = arith.constant 0 : index
    %90 = vector.load %arg1[%c288, %c0_23] : memref<344x128xbf16, #tpu.memory_space<vmem>>, vector<16x64xbf16>
    %91 = arith.extf %90 : vector<16x64xbf16> to vector<16x64xf32>
    %92 = arith.addf %89, %91 : vector<16x64xf32>
    %cst_24 = arith.constant dense<0xFF800000> : vector<16xf32>
    %93 = vector.multi_reduction <maximumf>, %92, %cst_24 [1] : vector<16x64xf32> to vector<16xf32>
    %94 = vector.shape_cast %93 : vector<16xf32> to vector<16x1xf32>
    %95 = vector.broadcast %94 : vector<16x1xf32> to vector<16x64xf32>
    %96 = arith.subf %92, %95 : vector<16x64xf32>
    %97 = math.exp %96 : vector<16x64xf32>
    %cst_25 = arith.constant 0.000000e+00 : f32
    %98 = vector.broadcast %cst_25 : f32 to vector<16x16xf32>
    %99 = vector.extract_strided_slice %97 {offsets = [0, 0], sizes = [16, 16], strides = [1, 1]} : vector<16x64xf32> to vector<16x16xf32>
    %cst_26 = arith.constant dense<0.000000e+00> : vector<16xf32>
    %100 = vector.multi_reduction <add>, %99, %cst_26 [1] : vector<16x16xf32> to vector<16xf32>
    %101 = vector.shape_cast %100 : vector<16xf32> to vector<16x1xf32>
    %102 = vector.extract_strided_slice %57 {offsets = [0, 0], sizes = [1, 16], strides = [1, 1]} : vector<4x16xf32> to vector<1x16xf32>
    %103 = vector.broadcast %102 : vector<1x16xf32> to vector<16x16xf32>
    %104 = vector.broadcast %101 : vector<16x1xf32> to vector<16x16xf32>
    %105 = arith.divf %103, %104 : vector<16x16xf32>
    %106 = arith.addf %98, %105 : vector<16x16xf32>
    %107 = vector.extract_strided_slice %97 {offsets = [0, 16], sizes = [16, 16], strides = [1, 1]} : vector<16x64xf32> to vector<16x16xf32>
    %cst_27 = arith.constant dense<0.000000e+00> : vector<16xf32>
    %108 = vector.multi_reduction <add>, %107, %cst_27 [1] : vector<16x16xf32> to vector<16xf32>
    %109 = vector.shape_cast %108 : vector<16xf32> to vector<16x1xf32>
    %110 = vector.extract_strided_slice %57 {offsets = [1, 0], sizes = [1, 16], strides = [1, 1]} : vector<4x16xf32> to vector<1x16xf32>
    %111 = vector.broadcast %110 : vector<1x16xf32> to vector<16x16xf32>
    %112 = vector.broadcast %109 : vector<16x1xf32> to vector<16x16xf32>
    %113 = arith.divf %111, %112 : vector<16x16xf32>
    %114 = arith.addf %106, %113 : vector<16x16xf32>
    %115 = vector.extract_strided_slice %97 {offsets = [0, 32], sizes = [16, 16], strides = [1, 1]} : vector<16x64xf32> to vector<16x16xf32>
    %cst_28 = arith.constant dense<0.000000e+00> : vector<16xf32>
    %116 = vector.multi_reduction <add>, %115, %cst_28 [1] : vector<16x16xf32> to vector<16xf32>
    %117 = vector.shape_cast %116 : vector<16xf32> to vector<16x1xf32>
    %118 = vector.extract_strided_slice %57 {offsets = [2, 0], sizes = [1, 16], strides = [1, 1]} : vector<4x16xf32> to vector<1x16xf32>
    %119 = vector.broadcast %118 : vector<1x16xf32> to vector<16x16xf32>
    %120 = vector.broadcast %117 : vector<16x1xf32> to vector<16x16xf32>
    %121 = arith.divf %119, %120 : vector<16x16xf32>
    %122 = arith.addf %114, %121 : vector<16x16xf32>
    %123 = vector.extract_strided_slice %97 {offsets = [0, 48], sizes = [16, 16], strides = [1, 1]} : vector<16x64xf32> to vector<16x16xf32>
    %cst_29 = arith.constant dense<0.000000e+00> : vector<16xf32>
    %124 = vector.multi_reduction <add>, %123, %cst_29 [1] : vector<16x16xf32> to vector<16xf32>
    %125 = vector.shape_cast %124 : vector<16xf32> to vector<16x1xf32>
    %126 = vector.extract_strided_slice %57 {offsets = [3, 0], sizes = [1, 16], strides = [1, 1]} : vector<4x16xf32> to vector<1x16xf32>
    %127 = vector.broadcast %126 : vector<1x16xf32> to vector<16x16xf32>
    %128 = vector.broadcast %125 : vector<16x1xf32> to vector<16x16xf32>
    %129 = arith.divf %127, %128 : vector<16x16xf32>
    %130 = arith.addf %122, %129 : vector<16x16xf32>
    %131 = arith.truncf %97 : vector<16x64xf32> to vector<16x64xbf16>
    %cst_30 = arith.constant dense<0.000000e+00> : vector<16x16xf32>
    %132 = tpu.matmul %131, %85, %cst_30 {dimension_numbers = #tpu.dot_dimension_numbers<[1], [0], [0], [1], [0, 0, 1, 1], [], []>} : vector<16x64xbf16>, vector<64x16xbf16>, vector<16x16xf32> -> vector<16x16xf32>
    %133 = arith.mulf %132, %130 : vector<16x16xf32>
    %134 = arith.truncf %133 : vector<16x16xf32> to vector<16x16xbf16>
    %c80 = arith.constant 80 : index
    %c0_31 = arith.constant 0 : index
    %135 = vector.load %arg1[%c80, %c0_31] : memref<344x128xbf16, #tpu.memory_space<vmem>>, vector<16x16xbf16>
    %cst_32 = arith.constant dense<0.000000e+00> : vector<16x16xf32>
    %136 = tpu.matmul %134, %135, %cst_32 {dimension_numbers = #tpu.dot_dimension_numbers<[1], [0], [0], [1], [0, 0, 1, 1], [], []>} : vector<16x16xbf16>, vector<16x16xbf16>, vector<16x16xf32> -> vector<16x16xf32>
    %c334 = arith.constant 334 : index
    %c0_33 = arith.constant 0 : index
    %137 = vector.load %arg1[%c334, %c0_33] : memref<344x128xbf16, #tpu.memory_space<vmem>>, vector<1x16xbf16>
    %138 = arith.extf %137 : vector<1x16xbf16> to vector<1x16xf32>
    %139 = vector.broadcast %138 : vector<1x16xf32> to vector<16x16xf32>
    %140 = arith.addf %136, %139 : vector<16x16xf32>
    %141 = vector.extract_strided_slice %33 {offsets = [0, 16], sizes = [16, 16], strides = [1, 1]} : vector<16x32xf32> to vector<16x16xf32>
    %c312 = arith.constant 312 : index
    %c0_34 = arith.constant 0 : index
    %142 = vector.load %arg1[%c312, %c0_34] : memref<344x128xbf16, #tpu.memory_space<vmem>>, vector<16x2xbf16>
    %143 = arith.extf %142 : vector<16x2xbf16> to vector<16x2xf32>
    %144 = vector.extract_strided_slice %143 {offsets = [0, 0], sizes = [16, 1], strides = [1, 1]} : vector<16x2xf32> to vector<16x1xf32>
    %145 = vector.extract_strided_slice %143 {offsets = [0, 1], sizes = [16, 1], strides = [1, 1]} : vector<16x2xf32> to vector<16x1xf32>
    %c1_i32 = arith.constant 1 : i32
    %146 = tpu.dynamic_rotate %141 by %c1_i32 dim 0 : vector<16x16xf32>, i32 -> vector<16x16xf32>
    %147 = vector.broadcast %144 : vector<16x1xf32> to vector<16x16xf32>
    %148 = arith.mulf %146, %147 : vector<16x16xf32>
    %c15_i32 = arith.constant 15 : i32
    %149 = tpu.dynamic_rotate %141 by %c15_i32 dim 0 : vector<16x16xf32>, i32 -> vector<16x16xf32>
    %150 = vector.broadcast %145 : vector<16x1xf32> to vector<16x16xf32>
    %151 = arith.mulf %149, %150 : vector<16x16xf32>
    %152 = tpu.concatenate %148, %141, %151 in 1 : vector<16x16xf32>, vector<16x16xf32>, vector<16x16xf32> -> vector<16x48xf32>
    %153 = arith.truncf %152 : vector<16x48xf32> to vector<16x48xbf16>
    %c96 = arith.constant 96 : index
    %c0_35 = arith.constant 0 : index
    %154 = vector.load %arg1[%c96, %c0_35] : memref<344x128xbf16, #tpu.memory_space<vmem>>, vector<48x16xbf16>
    %cst_36 = arith.constant dense<0.000000e+00> : vector<16x16xf32>
    %155 = tpu.matmul %153, %154, %cst_36 {dimension_numbers = #tpu.dot_dimension_numbers<[1], [0], [0], [1], [0, 0, 1, 1], [], []>} : vector<16x48xbf16>, vector<48x16xbf16>, vector<16x16xf32> -> vector<16x16xf32>
    %c335 = arith.constant 335 : index
    %c0_37 = arith.constant 0 : index
    %156 = vector.load %arg1[%c335, %c0_37] : memref<344x128xbf16, #tpu.memory_space<vmem>>, vector<1x16xbf16>
    %157 = arith.extf %156 : vector<1x16xbf16> to vector<1x16xf32>
    %158 = vector.broadcast %157 : vector<1x16xf32> to vector<16x16xf32>
    %159 = arith.addf %155, %158 : vector<16x16xf32>
    %cst_38 = arith.constant 5.000000e-01 : f32
    %160 = vector.broadcast %cst_38 : f32 to vector<16x16xf32>
    %161 = arith.mulf %160, %159 : vector<16x16xf32>
    %cst_39 = arith.constant 0.707106769 : f32
    %162 = vector.broadcast %cst_39 : f32 to vector<16x16xf32>
    %163 = arith.mulf %159, %162 : vector<16x16xf32>
    %164 = math.erf %163 : vector<16x16xf32>
    %cst_40 = arith.constant 1.000000e+00 : f32
    %165 = vector.broadcast %cst_40 : f32 to vector<16x16xf32>
    %166 = arith.addf %165, %164 : vector<16x16xf32>
    %167 = arith.mulf %161, %166 : vector<16x16xf32>
    %c1_i32_41 = arith.constant 1 : i32
    %168 = tpu.dynamic_rotate %167 by %c1_i32_41 dim 0 : vector<16x16xf32>, i32 -> vector<16x16xf32>
    %169 = vector.broadcast %144 : vector<16x1xf32> to vector<16x16xf32>
    %170 = arith.mulf %168, %169 : vector<16x16xf32>
    %c15_i32_42 = arith.constant 15 : i32
    %171 = tpu.dynamic_rotate %167 by %c15_i32_42 dim 0 : vector<16x16xf32>, i32 -> vector<16x16xf32>
    %172 = vector.broadcast %145 : vector<16x1xf32> to vector<16x16xf32>
    %173 = arith.mulf %171, %172 : vector<16x16xf32>
    %174 = tpu.concatenate %170, %167, %173 in 1 : vector<16x16xf32>, vector<16x16xf32>, vector<16x16xf32> -> vector<16x48xf32>
    %175 = arith.truncf %174 : vector<16x48xf32> to vector<16x48xbf16>
    %c144 = arith.constant 144 : index
    %c0_43 = arith.constant 0 : index
    %176 = vector.load %arg1[%c144, %c0_43] : memref<344x128xbf16, #tpu.memory_space<vmem>>, vector<48x16xbf16>
    %cst_44 = arith.constant dense<0.000000e+00> : vector<16x16xf32>
    %177 = tpu.matmul %175, %176, %cst_44 {dimension_numbers = #tpu.dot_dimension_numbers<[1], [0], [0], [1], [0, 0, 1, 1], [], []>} : vector<16x48xbf16>, vector<48x16xbf16>, vector<16x16xf32> -> vector<16x16xf32>
    %c336 = arith.constant 336 : index
    %c0_45 = arith.constant 0 : index
    %178 = vector.load %arg1[%c336, %c0_45] : memref<344x128xbf16, #tpu.memory_space<vmem>>, vector<1x16xbf16>
    %179 = arith.extf %178 : vector<1x16xbf16> to vector<1x16xf32>
    %180 = vector.broadcast %179 : vector<1x16xf32> to vector<16x16xf32>
    %181 = arith.addf %177, %180 : vector<16x16xf32>
    %182 = arith.truncf %140 : vector<16x16xf32> to vector<16x16xbf16>
    %c192 = arith.constant 192 : index
    %c0_46 = arith.constant 0 : index
    %183 = vector.load %arg1[%c192, %c0_46] : memref<344x128xbf16, #tpu.memory_space<vmem>>, vector<16x32xbf16>
    %cst_47 = arith.constant dense<0.000000e+00> : vector<16x32xf32>
    %184 = tpu.matmul %182, %183, %cst_47 {dimension_numbers = #tpu.dot_dimension_numbers<[1], [0], [0], [1], [0, 0, 1, 1], [], []>} : vector<16x16xbf16>, vector<16x32xbf16>, vector<16x32xf32> -> vector<16x32xf32>
    %185 = arith.truncf %181 : vector<16x16xf32> to vector<16x16xbf16>
    %c208 = arith.constant 208 : index
    %c0_48 = arith.constant 0 : index
    %186 = vector.load %arg1[%c208, %c0_48] : memref<344x128xbf16, #tpu.memory_space<vmem>>, vector<16x32xbf16>
    %cst_49 = arith.constant dense<0.000000e+00> : vector<16x32xf32>
    %187 = tpu.matmul %185, %186, %cst_49 {dimension_numbers = #tpu.dot_dimension_numbers<[1], [0], [0], [1], [0, 0, 1, 1], [], []>} : vector<16x16xbf16>, vector<16x32xbf16>, vector<16x32xf32> -> vector<16x32xf32>
    %188 = arith.addf %184, %187 : vector<16x32xf32>
    %c337 = arith.constant 337 : index
    %c0_50 = arith.constant 0 : index
    %189 = vector.load %arg1[%c337, %c0_50] : memref<344x128xbf16, #tpu.memory_space<vmem>>, vector<1x32xbf16>
    %190 = arith.extf %189 : vector<1x32xbf16> to vector<1x32xf32>
    %191 = vector.broadcast %190 : vector<1x32xf32> to vector<16x32xf32>
    %192 = arith.addf %188, %191 : vector<16x32xf32>
    %193 = arith.addf %7, %192 : vector<16x32xf32>
    %c338 = arith.constant 338 : index
    %c0_51 = arith.constant 0 : index
    %194 = vector.load %arg1[%c338, %c0_51] : memref<344x128xbf16, #tpu.memory_space<vmem>>, vector<1x32xbf16>
    %195 = arith.extf %194 : vector<1x32xbf16> to vector<1x32xf32>
    %c339 = arith.constant 339 : index
    %c0_52 = arith.constant 0 : index
    %196 = vector.load %arg1[%c339, %c0_52] : memref<344x128xbf16, #tpu.memory_space<vmem>>, vector<1x32xbf16>
    %197 = arith.extf %196 : vector<1x32xbf16> to vector<1x32xf32>
    %cst_53 = arith.constant dense<0.000000e+00> : vector<16xf32>
    %198 = vector.multi_reduction <add>, %193, %cst_53 [1] : vector<16x32xf32> to vector<16xf32>
    %199 = vector.shape_cast %198 : vector<16xf32> to vector<16x1xf32>
    %cst_54 = arith.constant 3.200000e+01 : f32
    %200 = vector.broadcast %cst_54 : f32 to vector<16x1xf32>
    %201 = arith.divf %199, %200 : vector<16x1xf32>
    %202 = vector.broadcast %201 : vector<16x1xf32> to vector<16x32xf32>
    %203 = arith.subf %193, %202 : vector<16x32xf32>
    %204 = arith.mulf %203, %203 : vector<16x32xf32>
    %cst_55 = arith.constant dense<0.000000e+00> : vector<16xf32>
    %205 = vector.multi_reduction <add>, %204, %cst_55 [1] : vector<16x32xf32> to vector<16xf32>
    %206 = vector.shape_cast %205 : vector<16xf32> to vector<16x1xf32>
    %cst_56 = arith.constant 3.200000e+01 : f32
    %207 = vector.broadcast %cst_56 : f32 to vector<16x1xf32>
    %208 = arith.divf %206, %207 : vector<16x1xf32>
    %209 = vector.broadcast %201 : vector<16x1xf32> to vector<16x32xf32>
    %210 = arith.subf %193, %209 : vector<16x32xf32>
    %cst_57 = arith.constant 9.99999997E-7 : f32
    %211 = vector.broadcast %cst_57 : f32 to vector<16x1xf32>
    %212 = arith.addf %208, %211 : vector<16x1xf32>
    %213 = math.sqrt %212 : vector<16x1xf32>
    %214 = vector.broadcast %213 : vector<16x1xf32> to vector<16x32xf32>
    %215 = arith.divf %210, %214 : vector<16x32xf32>
    %216 = vector.broadcast %195 : vector<1x32xf32> to vector<16x32xf32>
    %217 = arith.mulf %215, %216 : vector<16x32xf32>
    %218 = vector.broadcast %197 : vector<1x32xf32> to vector<16x32xf32>
    %219 = arith.addf %217, %218 : vector<16x32xf32>
    %220 = arith.truncf %219 : vector<16x32xf32> to vector<16x32xbf16>
    %c224 = arith.constant 224 : index
    %c0_58 = arith.constant 0 : index
    %221 = vector.load %arg1[%c224, %c0_58] : memref<344x128xbf16, #tpu.memory_space<vmem>>, vector<32x128xbf16>
    %cst_59 = arith.constant dense<0.000000e+00> : vector<16x128xf32>
    %222 = tpu.matmul %220, %221, %cst_59 {dimension_numbers = #tpu.dot_dimension_numbers<[1], [0], [0], [1], [0, 0, 1, 1], [], []>} : vector<16x32xbf16>, vector<32x128xbf16>, vector<16x128xf32> -> vector<16x128xf32>
    %c340 = arith.constant 340 : index
    %c0_60 = arith.constant 0 : index
    %223 = vector.load %arg1[%c340, %c0_60] : memref<344x128xbf16, #tpu.memory_space<vmem>>, vector<1x128xbf16>
    %224 = arith.extf %223 : vector<1x128xbf16> to vector<1x128xf32>
    %225 = vector.broadcast %224 : vector<1x128xf32> to vector<16x128xf32>
    %226 = arith.addf %222, %225 : vector<16x128xf32>
    %cst_61 = arith.constant 5.000000e-01 : f32
    %227 = vector.broadcast %cst_61 : f32 to vector<16x128xf32>
    %228 = arith.mulf %227, %226 : vector<16x128xf32>
    %cst_62 = arith.constant 0.707106769 : f32
    %229 = vector.broadcast %cst_62 : f32 to vector<16x128xf32>
    %230 = arith.mulf %226, %229 : vector<16x128xf32>
    %231 = math.erf %230 : vector<16x128xf32>
    %cst_63 = arith.constant 1.000000e+00 : f32
    %232 = vector.broadcast %cst_63 : f32 to vector<16x128xf32>
    %233 = arith.addf %232, %231 : vector<16x128xf32>
    %234 = arith.mulf %228, %233 : vector<16x128xf32>
    %235 = arith.truncf %234 : vector<16x128xf32> to vector<16x128xbf16>
    %c256 = arith.constant 256 : index
    %c0_64 = arith.constant 0 : index
    %236 = vector.load %arg1[%c256, %c0_64] : memref<344x128xbf16, #tpu.memory_space<vmem>>, vector<32x128xbf16>
    %cst_65 = arith.constant dense<0.000000e+00> : vector<16x32xf32>
    %237 = tpu.matmul %235, %236, %cst_65 {dimension_numbers = #tpu.dot_dimension_numbers<[1], [1], [0], [0], [0, 0, 1, 0], [], []>} : vector<16x128xbf16>, vector<32x128xbf16>, vector<16x32xf32> -> vector<16x32xf32>
    %c341 = arith.constant 341 : index
    %c0_66 = arith.constant 0 : index
    %238 = vector.load %arg1[%c341, %c0_66] : memref<344x128xbf16, #tpu.memory_space<vmem>>, vector<1x32xbf16>
    %239 = arith.extf %238 : vector<1x32xbf16> to vector<1x32xf32>
    %240 = vector.broadcast %239 : vector<1x32xf32> to vector<16x32xf32>
    %241 = arith.addf %237, %240 : vector<16x32xf32>
    %242 = arith.addf %193, %241 : vector<16x32xf32>
    %c0_67 = arith.constant 0 : index
    %c0_68 = arith.constant 0 : index
    %243 = vector.load %arg2[%c0_67, %c0_68] : memref<16x32xf32, #tpu.memory_space<vmem>>, vector<16x32xf32>
    tpu.vector_store %arg2[%c0_67, %c0_68], %242 {strides = array<i32>} : memref<16x32xf32, #tpu.memory_space<vmem>>, vector<16x32xf32>,
    return
  }
}

</mosaic_0001>

<bundles_post_ra>
// kernel: apply.1
= control target key start
LH: loop header
LB: loop body
LE: loop exit
PB: predicated region body
PF: predicated region fallthrough
CT: control target
= control target key end

     0   :  { %7 = vsyncpa [#allocation3], 0  ;;  %s1887_s0 = inlined_call_operand.hbm [shape: f32[16,32], index: 0, kind: input, shape index: {}]   ;;  %s1888_s1 = inlined_call_operand.hbm [shape: bf16[344,128], index: 1, kind: input, shape index: {}]   ;;  %s1889_s2 = inlined_call_operand.hbm [shape: f32[16,32], index: 2, kind: output, shape index: {}]  }
   0x1   :  { %8 = vsyncpa [#allocation6], 0 }
   0x2   :  { %9 = vsyncpa [#allocation4], 0  ;;  %s1560_s9 = smov [#allocation2]   ;;  %s1488_s13 = scalar_lea.hbm %s1887_s0, 256 }
   0x3   :  { %s15_s10 = sshll.u32 %s1560_s9, 4  ;;  %p1489_p0 = scmp.ne.s32.totalorder %s1887_s0, %s1488_s13  ;;  %s16_s10 = int_to_ptr.vmem [resolvable:$true] %s15_s10 }
   0x4   :  { %p1492_p1 = scmp.lt.u32.totalorder %s1488_s13, %s1887_s0 }
   0x6   :  { %p1494_p2 = pnand %p1492_p1, %p1489_p0 }
   0x8   :  { %1497 = shalt.err (!%p1494_p2)
}
   0x9   :  { %s1498_s18 = scalar_lea.vmem %s16_s10, 256  ;;  %p1503_p4 = scmp.lt.s32.totalorder %s16_s10, %s16_s10 }
   0xa   :  { %p1499_p3 = scmp.ne.s32.totalorder %s16_s10, %s1498_s18  ;;  %p1504_p5 = scmp.lt.s32.totalorder %s1498_s18, %s1498_s18 }
   0xc   :  { %p1505_p6 = por %p1504_p5, %p1503_p4 }
   0xe   :  { %p1506_p7 = pnand %p1505_p6, %p1499_p3 }
  0x10   :  { %1509 = shalt.err (!%p1506_p7)
}
  0x11   :  { %s1561_s19 = smov 128   ;;  %s1562_s20 = smov 8  }
  0x12   :  { %21 = dma.hbm_to_vmem [thread:$0]  %s1887_s0, 256, %s16_s10, [#allocation3], %s1561_s19, %s1561_s19, %s1562_s20  }
  0x13   :  { %s1563_s23 = smov [#allocation5]   ;;  %s1510_s27 = scalar_lea.hbm %s1888_s1, 2752 }
  0x14   :  { %s27_s24 = sshll.u32 %s1563_s23, 4  ;;  %p1511_p8 = scmp.ne.s32.totalorder %s1888_s1, %s1510_s27  ;;  %s28_s24 = int_to_ptr.vmem [resolvable:$true] %s27_s24 }
  0x15   :  { %p1514_p9 = scmp.lt.u32.totalorder %s1510_s27, %s1888_s1 }
  0x17   :  { %p1516_p10 = pnand %p1514_p9, %p1511_p8 }
  0x19   :  { %1519 = shalt.err (!%p1516_p10)
}
  0x1a   :  { %s1520_s4 = scalar_lea.vmem %s28_s24, 2752  ;;  %p1525_p12 = scmp.lt.s32.totalorder %s28_s24, %s28_s24 }
  0x1b   :  { %p1521_p11 = scmp.ne.s32.totalorder %s28_s24, %s1520_s4  ;;  %p1526_p13 = scmp.lt.s32.totalorder %s1520_s4, %s1520_s4 }
  0x1d   :  { %p1527_p0 = por %p1526_p13, %p1525_p12 }
  0x1f   :  { %p1528_p1 = pnand %p1527_p0, %p1521_p11 }
  0x21   :  { %1531 = shalt.err (!%p1528_p1)
}
  0x22   :  { %s1564_s0 = smov 64   ;;  %s1565_s5 = smov 4  }
  0x23   :  { %33 = dma.hbm_to_vmem [thread:$0]  %s1888_s1, 2752, %s28_s24, [#allocation6], %s1564_s0, %s1564_s0, %s1565_s5  }
  0x24   :  { %1554 = dma.done.wait [#allocation3], 256  }
  0x25   :  { %1555 = vsyncadd [#allocation3], 4294967040 }
  0x26   :  { %1556 = dma.done.wait [#allocation6], 2752  }
  0x27   :  { %1557 = vsyncadd [#allocation6], 4294964544  ;;  %v1566_v0 = vmov 0.0   ;;  %vm1567_vm0 = vmmov 0   ;;  %v1426_v1 = vld [vmem:[#allocation5] sm:$0xff]   ;;  %v1427_v2 = vld [vmem:[#allocation5 + $0x8] sm:$0xff]   ;;  %v50_v6 = vlaneseq }
  0x28   :  { %1278 = vmatprep.subr.bf16.mxu0 %v1566_v0  ;;  %1282 = vmatprep.mubr.msk.bf16.mxu0 %vm1567_vm0, %v1566_v0  ;;  %v41_v3 = vld [vmem:[#allocation2] sm:$0xff]  ;;  %v42_v4 = vld [vmem:[#allocation2 + $0x8] sm:$0xff]  ;;  %vm66_vm1 = vcmask 261120   ;;  %v48_v8 = vld [vmem:[#allocation5 + $0xa4] sm:$0x1]  ;;  %vm179_vm6 = vcmask 130048  }
  0x29   :  { %1292 = vmatprep.subr.bf16.mxu1 %v1566_v0  ;;  %1294 = vmatprep.mubr.msk.bf16.mxu1 %vm1567_vm0, %v1566_v0  ;;  %v43_v5 = vpack.c.bf16 %v42_v4, %v41_v3  ;;  %v1629_v7 = vshrl.u32 %v50_v6, 7  ;;  %v49_v9 = vunpack.c.l.bf16 %v48_v8  ;;  %v1428_v30 = vld [vmem:[#allocation5 + $0x10] sm:$0xff]   ;;  %v1429_v31 = vld [vmem:[#allocation5 + $0x18] sm:$0xff]   ;;  %v111_v49 = vld [vmem:[#allocation5 + $0xa4] sm:$0x2]  ;;  %vm439_vm7 = vcmask 523264  }
  0x2a   :  { %1279 = vmatpush3.bf16.msra.mxu0 %v1426_v1  ;;  %1293 = vmatpush3.bf16.msra.mxu1 %v1429_v31  ;;  %v112_v52 = vunpack.c.l.bf16 %v111_v49  ;;  %v1430_v62 = vld [vmem:[#allocation5 + $0x20] sm:$0xff]   ;;  %s1569_s1 = smov 112   ;;  %s1570_s8 = smov 96   ;;  %vm713_vm10 = vcmask 392192  }
  0x2b   :  { %1280 = vmatprep.subr.bf16.mxu0 %v1566_v0  ;;  %v1632_v10 = vsub.s32 0, %v1629_v7  ;;  %1304 = vmatprep.subr.bf16.mxu1 %v1566_v0  ;;  %v1650_v48 = vsub.s32 1, %v1629_v7  ;;  %v1654_v54 = vsub.s32 2, %v1629_v7  ;;  %v226_v1 = vld [vmem:[#allocation5 + $0xa4] sm:$0x4]  ;;  %v1674_v3 = vsub.s32 3, %v1629_v7 }
  0x2c   :  { %v227_v4 = vunpack.c.l.bf16 %v226_v1  ;;  %s1571_s9 = smov 80   ;;  %vm659_vm8 = vcmp.lt.s32.totalorder %v1629_v7, 7  ;;  %vm642_vm9 = vcmp.lt.s32.totalorder %v1629_v7, 1  ;;  %s1573_s10 = smov 32  }
  0x2d   :  { %v53_v11 = vrot.slane %v49_v9, %v1632_v10  ;;  %v157_v51 = vrot.slane %v49_v9, %v1650_v48  ;;  %v163_v58 = vrot.slane %v112_v52, %v1654_v54  ;;  %v172_v8 = vrot.slane %v112_v52, %v1674_v3  ;;  %s1574_s11 = smov 16   ;;  %s1575_s12 = smov [#allocation7]  }
  0x2e   :  { %1281 = vmatpush3.bf16.msra.mxu0 %v1427_v2  ;;  %v332_v2 = vld [vmem:[#allocation5 + $0x98] sm:$0x3]  ;;  %s1191_s13 = sshll.u32 %s1575_s12, 4  ;;  %s1192_s13 = int_to_ptr.vmem [resolvable:$true] %s1191_s13 }
  0x2f   :  { %1286 = vmatprep.subr.bf16.mxu0 %v1566_v0  ;;  %v333_v6 = vunpack.c.l.bf16 %v332_v2  ;;  %s1532_s14 = scalar_lea.vmem %s1192_s13, 256  ;;  %p1537_p3 = scmp.lt.s32.totalorder %s1192_s13, %s1192_s13 }
  0x30   :  { %p1533_p2 = scmp.ne.s32.totalorder %s1192_s13, %s1532_s14  ;;  %p1538_p4 = scmp.lt.s32.totalorder %s1532_s14, %s1532_s14 }
  0x31   :  { %1283 = vmatmul.mubr.msk.bf16.vlgmr.msra.gmra.mrb[0].mxu0 %vm66_vm1, %v43_v5  ;;  %v230_v5 = vsub.s32 4, %v1629_v7 }
  0x32   :  { %1288 = vmatprep.mubr.msk.bf16.mxu0 %vm1567_vm0, %v1566_v0  ;;  %1287 = vmatpush3.bf16.msra.mxu0 %v1428_v30  ;;  %p1539_p5 = por %p1538_p4, %p1537_p3 }
  0x33   :  { %1298 = vmatprep.subr.bf16.mxu0 %v1566_v0  ;;  %v231_v9 = vrot.slane %v227_v4, %v230_v5 }
  0x34   :  { %p1540_p6 = pnand %p1539_p5, %p1533_p2 }
 0x104   :  { %v104_v12 = vpop.f32.mrb[0].mxu0 }
 0x105   :  { %v1635_v13 = vadd.f32 %v104_v12, %v53_v11  ;;  %v1284_v14 = vpop.f32.mrb[1].mxu0  ;;  %v1684_v12 = vrot.slane %v333_v6, %v1650_v48 }
 0x106   :  { %v107_v15 = vpop.f32.mrb[2].mxu0 }
 0x107   :  { %v1637_v16 = vadd.f32 %v107_v15, %v53_v11  ;;  %v1285_v17 = vpop.f32.mrb[3].mxu0  ;;  %v113_v18 = vsel %vm66_vm1, %v1635_v13, 0.0  ;;  %v1681_v11 = vrot.slane %v333_v6, %v1632_v10 }
 0x108   :  { %114 = vadd.xlane.f32.xlu0 %v113_v18  ;;  %v283_v17 = vsub.s32 5, %v1629_v7  ;;  %v1688_v18 = vrot.slane %v333_v6, %v1654_v54 }
 0x109   :  { %v116_v19 = vsel %vm66_vm1, %v1637_v16, 0.0 }
 0x10a   :  { %v284_v30 = vrot.slane %v227_v4, %v283_v17 }
 0x10c   :  { %117 = vadd.xlane.f32.xlu0 %v116_v19 }
 0x195   :  { %v115_v20 = vpop.xlane.xlu0 %114 }
 0x196   :  { %v120_v21 = vmul.f32 0.03125, %v115_v20 }
 0x198   :  { %v122_v22 = vsub.f32 %v1635_v13, %v120_v21 }
 0x199   :  { %v118_v23 = vpop.xlane.xlu0 %117 }
 0x19a   :  { %v121_v24 = vmul.f32 0.03125, %v118_v23  ;;  %v124_v25 = vmul.f32 %v122_v22, %v122_v22  ;;  %v1693_v23 = vrot.slane %v333_v6, %v1674_v3 }
 0x19c   :  { %v123_v26 = vsub.f32 %v1637_v16, %v121_v24  ;;  %v126_v27 = vsel %vm66_vm1, %v124_v25, 0.0 }
 0x19d   :  { %127 = vadd.xlane.f32.xlu1 %v126_v27 }
 0x19e   :  { %v125_v28 = vmul.f32 %v123_v26, %v123_v26 }
 0x1a0   :  { %v129_v29 = vsel %vm66_vm1, %v125_v28, 0.0 }
 0x1a1   :  { %130 = vadd.xlane.f32.xlu1 %v129_v29 }
 0x22a   :  { %v128_v32 = vpop.xlane.xlu1 %127 }
 0x22b   :  { %v132_v33 = vmul.f32 0.03125, %v128_v32 }
 0x22d   :  { %v134_v34 = vadd.f32 1e-06, %v132_v33 }
 0x22e   :  { %v131_v35 = vpop.xlane.xlu1 %130 }
 0x22f   :  { %1444 = vrsqrt.f32 %v134_v34  ;;  %v133_v36 = vmul.f32 0.03125, %v131_v35  ;;  %vm138_vm2 = vcmp.eq.f32.partialorder %v134_v34, inf  ;;  %v141_v40 = vand.u32 2147483648, %v134_v34 }
 0x230   :  { %vm140_vm3 = vcmp.eq.f32.partialorder %v134_v34, 0.0 }
 0x231   :  { %v135_v37 = vadd.f32 1e-06, %v133_v36 }
 0x233   :  { %1446 = vrsqrt.f32 %v135_v37  ;;  %vm145_vm4 = vcmp.eq.f32.partialorder %v135_v37, inf  ;;  %v148_v45 = vand.u32 2147483648, %v135_v37  ;;  %vm147_vm5 = vcmp.eq.f32.partialorder %v135_v37, 0.0 }
 0x239   :  { %v1445_v38 = vpop.eup %1444 }
 0x23a   :  { %v137_v39 = vmul.f32 %v1445_v38, %v134_v34 }
 0x23c   :  { %v139_v41 = vsel %vm138_vm2, %v134_v34, %v137_v39 }
 0x23d   :  { %v142_v42 = vsel %vm140_vm3, %v141_v40, %v139_v41  ;;  %v1447_v43 = vpop.eup %1446 }
 0x23e   :  { %1448 = vrcp.f32 %v142_v42  ;;  %v144_v44 = vmul.f32 %v1447_v43, %v135_v37 }
 0x240   :  { %v146_v46 = vsel %vm145_vm4, %v135_v37, %v144_v44 }
 0x241   :  { %v149_v47 = vsel %vm147_vm5, %v148_v45, %v146_v46 }
 0x242   :  { %1450 = vrcp.f32 %v149_v47 }
 0x248   :  { %v1449_v50 = vpop.eup %1448 }
 0x249   :  { %v151_v53 = vmul.f32 %v1449_v50, %v122_v22 }
 0x24b   :  { %v158_v57 = vmul.f32 %v157_v51, %v151_v53 }
 0x24c   :  { %v1451_v55 = vpop.eup %1450 }
 0x24d   :  { %v153_v56 = vmul.f32 %v1451_v55, %v123_v26  ;;  %v1657_v60 = vadd.f32 %v163_v58, %v158_v57 }
 0x24f   :  { %v159_v59 = vmul.f32 %v157_v51, %v153_v56 }
 0x251   :  { %v1659_v61 = vadd.f32 %v163_v58, %v159_v59 }
 0x253   :  { %v166_v63 = vpack.c.bf16 %v1659_v61, %v1657_v60 }
 0x255   :  { %1289 = vmatmul.mubr.msk.bf16.vlgmr.msra.gmra.mrb[4].mxu0 %vm179_vm6, %v166_v63  ;;  %1295 = vmatmul.mubr.msk.bf16.vlgmr.msra.gmra.mrb[0].mxu1 %vm179_vm6, %v166_v63 }
 0x256   :  { %1299 = vmatpush3.bf16.msra.mxu0 %v1430_v62  ;;  %1300 = vmatprep.mubr.msk.bf16.mxu0 %vm1567_vm0, %v1566_v0 }
 0x257   :  { %1316 = vmatprep.subr.bf16.mxu0 %v1566_v0  ;;  %1312 = vmatprep.mubr.msk.bf16.mxu1 %vm1567_vm0, %v1566_v0 }
 0x25d   :  { %1301 = vmatmul.mubr.msk.bf16.vlgmr.msra.gmra.mrb[8].mxu0 %vm179_vm6, %v166_v63 }
 0x25e   :  { %1324 = vmatprep.mubr.msk.bf16.mxu0 %vm1567_vm0, %v1566_v0 }
 0x328   :  { %v217_v14 = vpop.f32.mrb[4].mxu0  ;;  %v272_v15 = vpop.f32.mrb[0].mxu1 }
 0x329   :  { %v1690_v19 = vadd.f32 %v217_v14, %v172_v8  ;;  %v273_v20 = vadd.f32 %v272_v15, %v231_v9  ;;  %v1290_v21 = vpop.f32.mrb[5].mxu0  ;;  %v1296_v22 = vpop.f32.mrb[1].mxu1  ;;  %v1238_v14 = vld [vmem:[#allocation5 + $0x90] sm:$0xff]  }
 0x32a   :  { %v220_v24 = vpop.f32.mrb[6].mxu0  ;;  %v275_v25 = vpop.f32.mrb[2].mxu1  ;;  %v1236_v15 = vunpack.c.l.bf16 %v1238_v14  ;;  %v1237_v22 = vunpack.c.h.bf16 %v1238_v14 }
 0x32b   :  { %v221_v26 = vadd.f32 %v220_v24, %v172_v8  ;;  %v276_v27 = vadd.f32 %v275_v25, %v231_v9  ;;  %v1291_v28 = vpop.f32.mrb[7].mxu0  ;;  %v1297_v29 = vpop.f32.mrb[3].mxu1  ;;  %v338_v31 = vmul.f32 %v1681_v11, %v273_v20  ;;  %v344_v32 = vmul.f32 %v1684_v12, %v273_v20 }
 0x32c   :  { %v350_v33 = vmul.f32 %v1688_v18, %v273_v20  ;;  %v356_v38 = vmul.f32 %v1693_v23, %v273_v20 }
 0x32d   :  { %v374_v34 = vpack.c.bf16 %v221_v26, %v1690_v19  ;;  %v339_v35 = vmul.f32 %v1681_v11, %v276_v27  ;;  %v345_v36 = vmul.f32 %v1684_v12, %v276_v27  ;;  %v351_v37 = vmul.f32 %v1688_v18, %v276_v27 }
 0x32e   :  { %v357_v39 = vmul.f32 %v1693_v23, %v276_v27 }
 0x32f   :  { %v358_v40 = vpack.c.bf16 %v339_v35, %v338_v31  ;;  %v359_v41 = vpack.c.bf16 %v345_v36, %v344_v32  ;;  %v360_v42 = vpack.c.bf16 %v351_v37, %v350_v33  ;;  %v1568_v31 = vmov 1  }
 0x330   :  { %v325_v43 = vpop.f32.mrb[8].mxu0  ;;  %v361_v44 = vpack.c.bf16 %v357_v39, %v356_v38  ;;  %1398 = vset.pattern.permute.xlu0 %v1568_v31  ;;  %v626_v38 = vld [vmem:[#allocation5 + $0x9c] sm:$0xff]  }
 0x331   :  { %v326_v45 = vadd.f32 %v325_v43, %v284_v30  ;;  %v1302_v46 = vpop.f32.mrb[9].mxu0  ;;  %v379_v47 = vsel %vm179_vm6, %v358_v40, 0  ;;  %v382_v6 = vsel %vm179_vm6, %v359_v41, 0  ;;  %v385_v8 = vsel %vm179_vm6, %v360_v42, 0 }
 0x332   :  { %v328_v49 = vpop.f32.mrb[10].mxu0  ;;  %1305 = vmatpush3.bf16.xpose.msra.mxu1 %v379_v47  ;;  %v388_v9 = vsel %vm179_vm6, %v361_v44, 0  ;;  %v628_v40 = vunpack.c.l.bf16 %v626_v38  ;;  %v629_v41 = vunpack.c.h.bf16 %v626_v38 }
 0x333   :  { %v1303_v50 = vpop.f32.mrb[11].mxu0  ;;  %1306 = vmatprep.subr.bf16.mxu1 %v1566_v0  ;;  %v329_v51 = vadd.f32 %v328_v49, %v284_v30  ;;  %v362_v52 = vmul.f32 %v1681_v11, %v326_v45  ;;  %v364_v53 = vmul.f32 %v1684_v12, %v326_v45  ;;  %v366_v55 = vmul.f32 %v1688_v18, %v326_v45 }
 0x334   :  { %v368_v56 = vmul.f32 %v1693_v23, %v326_v45  ;;  %v1399_v44 = vpack.i.bf16 %v629_v41, %v628_v40  ;;  %v1572_v45 = vmov 0  }
 0x335   :  { %v363_v57 = vmul.f32 %v1681_v11, %v329_v51  ;;  %v365_v58 = vmul.f32 %v1684_v12, %v329_v51  ;;  %v367_v59 = vmul.f32 %v1688_v18, %v329_v51  ;;  %v369_v62 = vmul.f32 %v1693_v23, %v329_v51 }
 0x337   :  { %v370_v63 = vpack.c.bf16 %v363_v57, %v362_v52  ;;  %v371_v1 = vpack.c.bf16 %v365_v58, %v364_v53  ;;  %v372_v2 = vpack.c.bf16 %v367_v59, %v366_v55  ;;  %v373_v4 = vpack.c.bf16 %v369_v62, %v368_v56 }
 0x339   :  { %1317 = vmatpush3.bf16.msra.mxu0 %v370_v63 }
 0x33a   :  { %1307 = vmatpush3.bf16.xpose.msra.mxu1 %v382_v6  ;;  %1318 = vmatprep.subr.bf16.mxu0 %v1566_v0 }
 0x33b   :  { %1308 = vmatprep.subr.bf16.mxu1 %v1566_v0 }
 0x33d   :  { %1319 = vmatpush3.bf16.msra.mxu0 %v371_v1 }
 0x33e   :  { %1320 = vmatprep.subr.bf16.mxu0 %v1566_v0 }
 0x341   :  { %1321 = vmatpush3.bf16.msra.mxu0 %v372_v2 }
 0x342   :  { %1309 = vmatpush3.bf16.xpose.msra.mxu1 %v385_v8  ;;  %1322 = vmatprep.subr.bf16.mxu0 %v1566_v0 }
 0x343   :  { %1310 = vmatprep.subr.bf16.mxu1 %v1566_v0 }
 0x345   :  { %1323 = vmatpush3.bf16.msra.mxu0 %v373_v4 }
 0x346   :  { %1328 = vmatprep.subr.bf16.mxu0 %v1566_v0 }
 0x34a   :  { %1311 = vmatpush3.bf16.xpose.msra.mxu1 %v388_v9 }
 0x34b   :  { %1344 = vmatprep.subr.bf16.mxu1 %v1566_v0 }
 0x351   :  { %1313 = vmatmul.mubr.msk.bf16.vlgmr.msra.gmra.mrb[4].mxu1 %vm179_vm6, %v374_v34 }
 0x352   :  { %1350 = vmatprep.mubr.msk.bf16.mxu1 %vm1567_vm0, %v1566_v0 }
 0x424   :  { %v424_v19 = vpop.f32.mrb[4].mxu1 }
 0x425   :  { %v431_v20 = vmul.f32 0.5, %v424_v19  ;;  %v1314_v21 = vpop.f32.mrb[5].mxu1 }
 0x426   :  { %v427_v24 = vpop.f32.mrb[6].mxu1 }
 0x427   :  { %v432_v25 = vmul.f32 0.5, %v427_v24  ;;  %v1315_v26 = vpop.f32.mrb[7].mxu1  ;;  %v437_v27 = vadd.f32 %v1236_v15, %v431_v20 }
 0x429   :  { %v440_v28 = vsel %vm439_vm7, %v437_v27, -inf  ;;  %v438_v29 = vadd.f32 %v1237_v22, %v432_v25 }
 0x42a   :  { %441 = vmax.xlane.f32.xlu0 %v440_v28  ;;  %v1431_v28 = vld [vmem:[#allocation5 + $0x28] sm:$0xff]  }
 0x42b   :  { %v443_v30 = vsel %vm439_vm7, %v438_v29, -inf }
 0x42c   :  { %444 = vmax.xlane.f32.xlu1 %v443_v30 }
 0x4b7   :  { %v442_v32 = vpop.xlane.xlu0 %441 }
 0x4b8   :  { %v446_v33 = vsub.f32 %v437_v27, %v442_v32 }
 0x4b9   :  { %v445_v34 = vpop.xlane.xlu1 %444 }
 0x4ba   :  { %v448_v35 = vmul.f32 1.442695, %v446_v33  ;;  %v447_v36 = vsub.f32 %v438_v29, %v445_v34 }
 0x4bc   :  { %1452 = vpow2.f32 %v448_v35  ;;  %v450_v37 = vmul.f32 1.442695, %v447_v36 }
 0x4be   :  { %1454 = vpow2.f32 %v450_v37 }
 0x4c6   :  { %v1453_v39 = vpop.eup %1452 }
 0x4c7   :  { %466 = vrot.lane.b32.xlu0 %v1453_v39, %s1569_s1  ;;  %484 = vrot.lane.b32.xlu1 %v1453_v39, %s1570_s8  ;;  %v452_v46 = vsel %vm179_vm6, %v1453_v39, 0.0 }
 0x4c8   :  { %v1455_v42 = vpop.eup %1454 }
 0x4c9   :  { %v520_v43 = vpack.c.bf16 %v1455_v42, %v1453_v39  ;;  %v455_v47 = vsel %vm179_vm6, %v1455_v42, 0.0 }
 0x4cb   :  { %502 = vrot.lane.b32.xlu0 %v1453_v39, %s1571_s9  ;;  %468 = vrot.lane.b32.xlu1 %v1455_v42, %s1569_s1 }
 0x4cc   :  { %1325 = vmatmul.mubr.msk.bf16.vlgmr.msra.gmra.mrb[12].mxu0 %vm439_vm7, %v520_v43 }
 0x4cd   :  { %1330 = vmatprep.mubr.msk.bf16.mxu0 %vm1567_vm0, %v1566_v0  ;;  %1329 = vmatpush3.bf16.msra.mxu0 %v1431_v28 }
 0x4ce   :  { %1334 = vmatprep.subr.bf16.mxu0 %v1566_v0 }
 0x4cf   :  { %1400 = vperm.xlu0 %1398, %v1399_v44   ;;  %486 = vrot.lane.b32.xlu1 %v1455_v42, %s1570_s8 }
 0x4d3   :  { %504 = vrot.lane.b32.xlu1 %v1455_v42, %s1571_s9  ;;  %1404 = vset.pattern.permute.xlu0 %v1572_v45 }
 0x4d7   :  { %632 = vrot.lane.b32.xlu1 %v1657_v60, %s1569_s1 }
 0x4db   :  { %634 = vrot.lane.b32.xlu1 %v1659_v61, %s1569_s1 }
 0x4ee   :  { %453 = vadd.xlane.f32.xlu0 %v452_v46 }
 0x4ff   :  { %456 = vadd.xlane.f32.xlu1 %v455_v47 }
 0x539   :  { %v467_v49 = vpop.permute.xlu0 %466  ;;  %v485_v50 = vpop.permute.xlu1 %484 }
 0x53a   :  { %v472_v51 = vsel %vm179_vm6, %v467_v49, 0.0  ;;  %v490_v53 = vsel %vm179_vm6, %v485_v50, 0.0 }
 0x53b   :  { %473 = vadd.xlane.f32.xlu0 %v472_v51 }
 0x53d   :  { %v469_v52 = vpop.permute.xlu1 %468  ;;  %v503_v58 = vpop.permute.xlu0 %502 }
 0x53e   :  { %v475_v56 = vsel %vm179_vm6, %v469_v52, 0.0  ;;  %v508_v62 = vsel %vm179_vm6, %v503_v58, 0.0 }
 0x53f   :  { %491 = vadd.xlane.f32.xlu0 %v490_v53 }
 0x541   :  { %v487_v55 = vpop.permute.xlu1 %486 }
 0x542   :  { %v493_v57 = vsel %vm179_vm6, %v487_v55, 0.0 }
 0x543   :  { %476 = vadd.xlane.f32.xlu0 %v475_v56  ;;  %494 = vadd.xlane.f32.xlu1 %v493_v57 }
 0x545   :  { %v505_v59 = vpop.permute.xlu1 %504 }
 0x546   :  { %v511_v63 = vsel %vm179_vm6, %v505_v59, 0.0 }
 0x547   :  { %509 = vadd.xlane.f32.xlu0 %v508_v62  ;;  %512 = vadd.xlane.f32.xlu1 %v511_v63 }
 0x549   :  { %v633_v1 = vpop.permute.xlu1 %632 }
 0x54a   :  { %v638_v4 = vrot.slane %v633_v1, 7  ;;  %v657_v6 = vrot.slane %v633_v1, 1 }
 0x54d   :  { %v635_v2 = vpop.permute.xlu1 %634 }
 0x54e   :  { %v639_v8 = vrot.slane %v635_v2, 7  ;;  %v658_v9 = vrot.slane %v635_v2, 1  ;;  %v1747_v14 = vpop.permute.xlu0 %1400 }
 0x54f   :  { %v1403_v15 = vunpack.i.h.bf16 %v1747_v14  ;;  %v1402_v19 = vunpack.i.l.bf16 %v1747_v14 }
 0x550   :  { %v660_v20 = vsel %vm659_vm8, %v657_v6, %v658_v9  ;;  %v661_v21 = vsel %vm659_vm8, %v658_v9, %v657_v6  ;;  %v643_v22 = vsel %vm642_vm9, %v638_v4, %v639_v8  ;;  %v644_v24 = vsel %vm642_vm9, %v639_v8, %v638_v4 }
 0x551   :  { %v670_v25 = vmul.f32 %v1402_v19, %v660_v20  ;;  %v671_v26 = vmul.f32 %v1403_v15, %v661_v21 }
 0x553   :  { %v1410_v27 = vpack.i.bf16 %v671_v26, %v670_v25 }
 0x558   :  { %1411 = vrot.lane.b32.xlu1 %v1410_v27, %s1573_s10 }
 0x55d   :  { %1406 = vperm.xlu0 %1404, %v1399_v44  }
 0x561   :  { %1425 = vset.pattern.permute.xlu0 %v1568_v31 }
 0x57b   :  { %v454_v34 = vpop.xlane.xlu0 %453 }
 0x57c   :  { %1456 = vrcp.f32 %v454_v34 }
 0x586   :  { %v1457_v41 = vpop.eup %1456 }
 0x587   :  { %v459_v49 = vmul.f32 %v1457_v41, %v1681_v11 }
 0x58c   :  { %v457_v36 = vpop.xlane.xlu1 %456 }
 0x59f   :  { %v558_v29 = vpop.f32.mrb[12].mxu0 }
 0x5a0   :  { %v1326_v30 = vpop.f32.mrb[13].mxu0 }
 0x5a1   :  { %v561_v32 = vpop.f32.mrb[14].mxu0 }
 0x5a2   :  { %v1327_v33 = vpop.f32.mrb[15].mxu0 }
 0x5a3   :  { %v1432_v33 = vld [vmem:[#allocation5 + $0x30] sm:$0xff]  }
 0x5c8   :  { %v474_v35 = vpop.xlane.xlu0 %473 }
 0x5c9   :  { %1458 = vrcp.f32 %v474_v35  ;;  %v574_v35 = vsub.s32 6, %v1629_v7 }
 0x5ca   :  { %1460 = vrcp.f32 %v457_v36 }
 0x5cc   :  { %v492_v37 = vpop.xlane.xlu0 %491 }
 0x5cd   :  { %1462 = vrcp.f32 %v492_v37 }
 0x5d0   :  { %v477_v38 = vpop.xlane.xlu0 %476  ;;  %v495_v39 = vpop.xlane.xlu1 %494 }
 0x5d1   :  { %1464 = vrcp.f32 %v477_v38 }
 0x5d2   :  { %1466 = vrcp.f32 %v495_v39 }
 0x5d3   :  { %v1459_v42 = vpop.eup %1458 }
 0x5d4   :  { %v510_v31 = vpop.xlane.xlu0 %509  ;;  %v513_v40 = vpop.xlane.xlu1 %512  ;;  %v479_v45 = vmul.f32 %v1459_v42, %v1684_v12 }
 0x5d5   :  { %1468 = vrcp.f32 %v510_v31  ;;  %v1461_v43 = vpop.eup %1460 }
 0x5d6   :  { %1470 = vrcp.f32 %v513_v40  ;;  %v461_v50 = vmul.f32 %v1461_v43, %v1681_v11  ;;  %v482_v58 = vadd.f32 %v479_v45, %v459_v49  ;;  %v693_v43 = vsub.s32 7, %v1629_v7 }
 0x5d7   :  { %v1463_v44 = vpop.eup %1462 }
 0x5d8   :  { %v497_v51 = vmul.f32 %v1463_v44, %v1688_v18  ;;  %v1412_v53 = vpop.permute.xlu1 %1411 }
 0x5d9   :  { %v1414_v1 = vunpack.i.h.bf16 %v1412_v53  ;;  %v1413_v9 = vunpack.i.l.bf16 %v1412_v53 }
 0x5da   :  { %v500_v4 = vadd.f32 %v497_v51, %v482_v58  ;;  %v1436_v58 = vld [vmem:[#allocation5 + $0x50] sm:$0xff]  }
 0x5db   :  { %v1465_v46 = vpop.eup %1464 }
 0x5dc   :  { %v1467_v47 = vpop.eup %1466  ;;  %v481_v52 = vmul.f32 %v1465_v46, %v1684_v12  ;;  %v1771_v55 = vpop.permute.xlu0 %1406 }
 0x5dd   :  { %v1409_v56 = vunpack.i.h.bf16 %v1771_v55  ;;  %v1408_v57 = vunpack.i.l.bf16 %v1771_v55  ;;  %v499_v62 = vmul.f32 %v1467_v47, %v1688_v18  ;;  %v807_v55 = vld [vmem:[#allocation5 + $0xa8] sm:$0x1] }
 0x5de   :  { %v483_v59 = vadd.f32 %v481_v52, %v461_v50 }
 0x5df   :  { %v1469_v63 = vpop.eup %1468  ;;  %v655_v11 = vmul.f32 %v1408_v57, %v644_v24  ;;  %v656_v2 = vmul.f32 %v1409_v56, %v643_v22 }
 0x5e0   :  { %v1471_v12 = vpop.eup %1470  ;;  %v501_v6 = vadd.f32 %v499_v62, %v483_v59  ;;  %v515_v8 = vmul.f32 %v1469_v63, %v1693_v23 }
 0x5e1   :  { %v517_v20 = vmul.f32 %v1471_v12, %v1693_v23  ;;  %v680_v21 = vsel %vm179_vm6, %v655_v11, %v1657_v60  ;;  %v681_v18 = vsel %vm179_vm6, %v656_v2, %v1659_v61  ;;  %v1433_v23 = vld [vmem:[#allocation5 + $0x38] sm:$0xff]   ;;  %v1434_v60 = vld [vmem:[#allocation5 + $0x40] sm:$0xff]   ;;  %v1435_v61 = vld [vmem:[#allocation5 + $0x48] sm:$0xff]  }
 0x5e2   :  { %v518_v25 = vadd.f32 %v515_v8, %v500_v4  ;;  %v682_v24 = vsel %vm66_vm1, %v680_v21, %v1413_v9  ;;  %v683_v26 = vsel %vm66_vm1, %v681_v18, %v1414_v1  ;;  %1345 = vmatpush3.bf16.msra.mxu1 %v1435_v61  ;;  %v1437_v1 = vld [vmem:[#allocation5 + $0x58] sm:$0xff]  }
 0x5e3   :  { %v519_v22 = vadd.f32 %v517_v20, %v501_v6  ;;  %v684_v27 = vpack.c.bf16 %v683_v26, %v682_v24  ;;  %1346 = vmatprep.subr.bf16.mxu1 %v1566_v0 }
 0x5e4   :  { %v565_v28 = vmul.f32 %v558_v29, %v518_v25  ;;  %v570_v29 = vld [vmem:[#allocation5 + $0xa4] sm:$0x8] }
 0x5e5   :  { %v566_v30 = vmul.f32 %v561_v32, %v519_v22  ;;  %v571_v32 = vunpack.c.l.bf16 %v570_v29 }
 0x5e6   :  { %1347 = vmatpush3.bf16.msra.mxu1 %v1436_v58 }
 0x5e7   :  { %v567_v34 = vpack.c.bf16 %v566_v30, %v565_v28  ;;  %v575_v36 = vrot.slane %v571_v32, %v574_v35  ;;  %v694_v44 = vrot.slane %v571_v32, %v693_v43  ;;  %1348 = vmatprep.subr.bf16.mxu1 %v1566_v0 }
 0x5e9   :  { %1331 = vmatmul.mubr.msk.bf16.vlgmr.msra.gmra.mrb[16].mxu0 %vm179_vm6, %v567_v34 }
 0x5ea   :  { %1335 = vmatpush3.bf16.msra.mxu0 %v1432_v33  ;;  %1340 = vmatprep.mubr.msk.bf16.mxu0 %vm1567_vm0, %v1566_v0  ;;  %v1439_v33 = vld [vmem:[#allocation5 + $0x68] sm:$0xff]  }
 0x5eb   :  { %1336 = vmatprep.subr.bf16.mxu0 %v1566_v0  ;;  %1349 = vmatpush3.bf16.msra.mxu1 %v1437_v1 }
 0x5ec   :  { %1360 = vmatprep.subr.bf16.mxu1 %v1566_v0 }
 0x5ee   :  { %1337 = vmatpush3.bf16.msra.mxu0 %v1433_v23 }
 0x5ef   :  { %1338 = vmatprep.subr.bf16.mxu0 %v1566_v0 }
 0x5f2   :  { %1339 = vmatpush3.bf16.msra.mxu0 %v1434_v60 }
 0x5f3   :  { %1354 = vmatprep.subr.bf16.mxu0 %v1566_v0 }
 0x5f5   :  { %1341 = vmatmul.mubr.msk.bf16.vlgmr.msra.gmra.mrb[20].mxu0 %vm713_vm10, %v684_v27 }
 0x5f6   :  { %1356 = vmatprep.mubr.msk.bf16.mxu0 %vm1567_vm0, %v1566_v0  ;;  %1355 = vmatpush3.bf16.msra.mxu0 %v1439_v33 }
 0x5f7   :  { %1366 = vmatprep.subr.bf16.mxu0 %v1566_v0 }
 0x6bc   :  { %v619_v37 = vpop.f32.mrb[16].mxu0 }
 0x6bd   :  { %v1332_v38 = vpop.f32.mrb[17].mxu0  ;;  %v1799_v31 = vadd.f32 %v619_v37, %v575_v36 }
 0x6be   :  { %v622_v39 = vpop.f32.mrb[18].mxu0  ;;  %v1438_v38 = vld [vmem:[#allocation5 + $0x60] sm:$0xff]  }
 0x6bf   :  { %v1801_v40 = vadd.f32 %v622_v39, %v575_v36  ;;  %v1333_v41 = vpop.f32.mrb[19].mxu0 }
 0x6c1   :  { %v875_v42 = vpack.c.bf16 %v1801_v40, %v1799_v31 }
 0x6c8   :  { %v751_v45 = vpop.f32.mrb[20].mxu0 }
 0x6c9   :  { %v752_v46 = vadd.f32 %v751_v45, %v694_v44  ;;  %v1342_v47 = vpop.f32.mrb[21].mxu0 }
 0x6ca   :  { %v754_v49 = vpop.f32.mrb[22].mxu0 }
 0x6cb   :  { %v760_v50 = vmul.f32 0.70710677, %v752_v46  ;;  %v755_v51 = vadd.f32 %v754_v49, %v694_v44  ;;  %v1343_v52 = vpop.f32.mrb[23].mxu0  ;;  %v758_v62 = vmul.f32 0.5, %v752_v46 }
 0x6cd   :  { %1472 = verf.f32 %v760_v50  ;;  %v761_v53 = vmul.f32 0.70710677, %v755_v51  ;;  %v759_v12 = vmul.f32 0.5, %v755_v51 }
 0x6cf   :  { %1474 = verf.f32 %v761_v53 }
 0x6d7   :  { %v1473_v59 = vpop.eup %1472 }
 0x6d8   :  { %v764_v63 = vadd.f32 1.0, %v1473_v59 }
 0x6d9   :  { %v1475_v11 = vpop.eup %1474 }
 0x6da   :  { %v766_v2 = vmul.f32 %v764_v63, %v758_v62  ;;  %v765_v4 = vadd.f32 1.0, %v1475_v11 }
 0x6dc   :  { %v767_v6 = vmul.f32 %v765_v4, %v759_v12  ;;  %v768_v8 = vrot.slane %v766_v2, 7  ;;  %v774_v9 = vrot.slane %v766_v2, 1 }
 0x6de   :  { %v769_v20 = vrot.slane %v767_v6, 7  ;;  %v775_v21 = vrot.slane %v767_v6, 1  ;;  %v1415_v18 = vpack.i.bf16 %v767_v6, %v766_v2 }
 0x6e0   :  { %1416 = vrot.lane.b32.xlu1 %v1415_v18, %s1574_s11  ;;  %v776_v25 = vsel %vm659_vm8, %v774_v9, %v775_v21  ;;  %v777_v24 = vsel %vm659_vm8, %v775_v21, %v774_v9  ;;  %v770_v26 = vsel %vm642_vm9, %v768_v8, %v769_v20  ;;  %v771_v22 = vsel %vm642_vm9, %v769_v20, %v768_v8 }
 0x6e1   :  { %v778_v27 = vmul.f32 %v1402_v19, %v776_v25  ;;  %v779_v28 = vmul.f32 %v1403_v15, %v777_v24  ;;  %v772_v61 = vmul.f32 %v1408_v57, %v771_v22  ;;  %v773_v29 = vmul.f32 %v1409_v56, %v770_v26  ;;  %v1440_v24 = vld [vmem:[#allocation5 + $0x70] sm:$0xff]   ;;  %v1441_v26 = vld [vmem:[#allocation5 + $0x78] sm:$0xff]  }
 0x6e2   :  { %v808_v56 = vunpack.c.l.bf16 %v807_v55 }
 0x6e3   :  { %v1420_v30 = vpack.i.bf16 %v779_v28, %v778_v27 }
 0x6e4   :  { %v812_v57 = vrot.slane %v808_v56, %v1632_v10  ;;  %v984_v51 = vrot.slane %v808_v56, %v1650_v48 }
 0x6e5   :  { %1421 = vrot.lane.b32.xlu1 %v1420_v30, %s1573_s10 }
 0x752   :  { %v1417_v34 = vpop.permute.xlu1 %1416 }
 0x753   :  { %v1419_v23 = vunpack.i.h.bf16 %v1417_v34  ;;  %v1418_v60 = vunpack.i.l.bf16 %v1417_v34 }
 0x755   :  { %v796_v15 = vsel %vm179_vm6, %v772_v61, %v1418_v60  ;;  %v797_v35 = vsel %vm179_vm6, %v773_v29, %v1419_v23 }
 0x757   :  { %v1422_v19 = vpop.permute.xlu1 %1421 }
 0x758   :  { %v1424_v32 = vunpack.i.h.bf16 %v1422_v19  ;;  %v1423_v14 = vunpack.i.l.bf16 %v1422_v19 }
 0x75a   :  { %v798_v36 = vsel %vm66_vm1, %v796_v15, %v1423_v14  ;;  %v799_v37 = vsel %vm66_vm1, %v797_v35, %v1424_v32 }
 0x75b   :  { %v800_v39 = vpack.c.bf16 %v799_v37, %v798_v36  ;;  %v989_v37 = vld [vmem:[#allocation5 + $0xa8] sm:$0x2] }
 0x75d   :  { %1351 = vmatmul.mubr.msk.bf16.vlgmr.msra.gmra.mrb[8].mxu1 %vm713_vm10, %v800_v39 }
 0x75e   :  { %1361 = vmatpush3.bf16.msra.mxu1 %v1438_v38  ;;  %1362 = vmatprep.mubr.msk.bf16.mxu1 %vm1567_vm0, %v1566_v0  ;;  %v990_v38 = vunpack.c.l.bf16 %v989_v37 }
 0x75f   :  { %1374 = vmatprep.subr.bf16.mxu1 %v1566_v0 }
 0x760   :  { %v1034_v55 = vrot.slane %v990_v38, %v1654_v54 }
 0x765   :  { %1363 = vmatmul.mubr.msk.bf16.vlgmr.msra.gmra.mrb[12].mxu1 %vm179_vm6, %v875_v42 }
 0x766   :  { %1378 = vmatprep.mubr.msk.bf16.mxu1 %vm1567_vm0, %v1566_v0 }
 0x830   :  { %v868_v41 = vpop.f32.mrb[8].mxu1 }
 0x831   :  { %v1352_v43 = vpop.f32.mrb[9].mxu1  ;;  %v869_v45 = vadd.f32 %v868_v41, %v812_v57  ;;  %v1040_v41 = vrot.slane %v990_v38, %v1674_v3 }
 0x832   :  { %v871_v44 = vpop.f32.mrb[10].mxu1 }
 0x833   :  { %v872_v46 = vadd.f32 %v871_v44, %v812_v57  ;;  %v1353_v47 = vpop.f32.mrb[11].mxu1 }
 0x835   :  { %v878_v49 = vpack.c.bf16 %v872_v46, %v869_v45 }
 0x837   :  { %1357 = vmatmul.mubr.msk.bf16.vlgmr.msra.gmra.mrb[24].mxu0 %vm179_vm6, %v878_v49 }
 0x838   :  { %v974_v50 = vpop.f32.mrb[12].mxu1  ;;  %1370 = vmatprep.mubr.msk.bf16.mxu0 %vm1567_vm0, %v1566_v0  ;;  %1367 = vmatpush3.bf16.msra.mxu0 %v1440_v24 }
 0x839   :  { %v1364_v31 = vpop.f32.mrb[13].mxu1  ;;  %1368 = vmatprep.subr.bf16.mxu0 %v1566_v0 }
 0x83a   :  { %v977_v40 = vpop.f32.mrb[14].mxu1  ;;  %v1443_v31 = vld [vmem:[#allocation5 + $0x88] sm:$0xff]  }
 0x83b   :  { %v1365_v42 = vpop.f32.mrb[15].mxu1 }
 0x83c   :  { %1369 = vmatpush3.bf16.msra.mxu0 %v1441_v26 }
 0x90a   :  { %v924_v52 = vpop.f32.mrb[24].mxu0 }
 0x90b   :  { %v975_v10 = vadd.f32 %v974_v50, %v924_v52  ;;  %v1358_v53 = vpop.f32.mrb[25].mxu0  ;;  %v1442_v50 = vld [vmem:[#allocation5 + $0x80] sm:$0xff]  }
 0x90c   :  { %v927_v58 = vpop.f32.mrb[26].mxu0  ;;  %1375 = vmatpush3.bf16.xpose.msra.mxu1 %v1442_v50 }
 0x90d   :  { %v985_v59 = vadd.f32 %v984_v51, %v975_v10  ;;  %v978_v62 = vadd.f32 %v977_v40, %v927_v58  ;;  %v1359_v63 = vpop.f32.mrb[27].mxu0  ;;  %1376 = vmatprep.subr.bf16.mxu1 %v1566_v0  ;;  %v1048_v40 = vld [vmem:[#allocation5 + $0xa8] sm:$0x4] }
 0x90e   :  { %v1049_v54 = vunpack.c.l.bf16 %v1048_v40 }
 0x90f   :  { %v1846_v1 = vadd.f32 %v985_v59, %v1635_v13  ;;  %v986_v11 = vadd.f32 %v984_v51, %v978_v62 }
 0x910   :  { %v1053_v42 = vrot.slane %v1049_v54, %v230_v5  ;;  %v1128_v5 = vrot.slane %v1049_v54, %v283_v17 }
 0x911   :  { %v1849_v2 = vadd.f32 %v986_v11, %v1637_v16  ;;  %v991_v12 = vsel %vm66_vm1, %v1846_v1, 0.0 }
 0x912   :  { %992 = vadd.xlane.f32.xlu1 %v991_v12 }
 0x913   :  { %v994_v48 = vsel %vm66_vm1, %v1849_v2, 0.0 }
 0x914   :  { %995 = vadd.xlane.f32.xlu0 %v994_v48  ;;  %1377 = vmatpush3.bf16.xpose.msra.mxu1 %v1443_v31 }
 0x99f   :  { %v993_v4 = vpop.xlane.xlu1 %992 }
 0x9a0   :  { %v997_v6 = vmul.f32 0.03125, %v993_v4 }
 0x9a1   :  { %v996_v8 = vpop.xlane.xlu0 %995 }
 0x9a2   :  { %v999_v9 = vsub.f32 %v1846_v1, %v997_v6  ;;  %v998_v20 = vmul.f32 0.03125, %v996_v8 }
 0x9a4   :  { %v1000_v13 = vsub.f32 %v1849_v2, %v998_v20  ;;  %v1001_v21 = vmul.f32 %v999_v9, %v999_v9 }
 0x9a6   :  { %v1003_v16 = vsel %vm66_vm1, %v1001_v21, 0.0  ;;  %v1002_v18 = vmul.f32 %v1000_v13, %v1000_v13 }
 0x9a7   :  { %1004 = vadd.xlane.f32.xlu1 %v1003_v16 }
 0x9a8   :  { %v1006_v25 = vsel %vm66_vm1, %v1002_v18, 0.0 }
 0x9ab   :  { %1007 = vadd.xlane.f32.xlu1 %v1006_v25 }
 0xa34   :  { %v1005_v22 = vpop.xlane.xlu1 %1004 }
 0xa35   :  { %v1009_v27 = vmul.f32 0.03125, %v1005_v22 }
 0xa37   :  { %v1011_v28 = vadd.f32 1e-06, %v1009_v27 }
 0xa38   :  { %v1008_v30 = vpop.xlane.xlu1 %1007 }
 0xa39   :  { %1476 = vrsqrt.f32 %v1011_v28  ;;  %v1010_v33 = vmul.f32 0.03125, %v1008_v30  ;;  %vm1015_vm11 = vcmp.eq.f32.partialorder %v1011_v28, inf  ;;  %v1018_v61 = vand.u32 2147483648, %v1011_v28 }
 0xa3a   :  { %vm1017_vm12 = vcmp.eq.f32.partialorder %v1011_v28, 0.0 }
 0xa3b   :  { %v1012_v34 = vadd.f32 1e-06, %v1010_v33 }
 0xa3d   :  { %1478 = vrsqrt.f32 %v1012_v34  ;;  %vm1022_vm13 = vcmp.eq.f32.partialorder %v1012_v34, inf  ;;  %v1025_v15 = vand.u32 2147483648, %v1012_v34  ;;  %vm1024_vm14 = vcmp.eq.f32.partialorder %v1012_v34, 0.0 }
 0xa43   :  { %v1477_v23 = vpop.eup %1476 }
 0xa44   :  { %v1014_v60 = vmul.f32 %v1477_v23, %v1011_v28 }
 0xa46   :  { %v1016_v29 = vsel %vm1015_vm11, %v1011_v28, %v1014_v60 }
 0xa47   :  { %v1019_v19 = vsel %vm1017_vm12, %v1018_v61, %v1016_v29  ;;  %v1479_v32 = vpop.eup %1478 }
 0xa48   :  { %1480 = vrcp.f32 %v1019_v19  ;;  %v1021_v14 = vmul.f32 %v1479_v32, %v1012_v34 }
 0xa4a   :  { %v1023_v35 = vsel %vm1022_vm13, %v1012_v34, %v1021_v14 }
 0xa4b   :  { %v1026_v36 = vsel %vm1024_vm14, %v1025_v15, %v1023_v35 }
 0xa4c   :  { %1482 = vrcp.f32 %v1026_v36 }
 0xa52   :  { %v1481_v39 = vpop.eup %1480 }
 0xa53   :  { %v1028_v56 = vmul.f32 %v1481_v39, %v999_v9 }
 0xa55   :  { %v1035_v44 = vmul.f32 %v1034_v55, %v1028_v56 }
 0xa56   :  { %v1483_v57 = vpop.eup %1482 }
 0xa57   :  { %v1030_v43 = vmul.f32 %v1483_v57, %v1000_v13  ;;  %v1041_v46 = vadd.f32 %v1040_v41, %v1035_v44 }
 0xa59   :  { %v1036_v45 = vmul.f32 %v1034_v55, %v1030_v43 }
 0xa5b   :  { %v1042_v47 = vadd.f32 %v1040_v41, %v1036_v45 }
 0xa5d   :  { %v1043_v49 = vpack.c.bf16 %v1042_v47, %v1041_v46 }
 0xa5f   :  { %1371 = vmatmul.mubr.msk.bf16.vlgmr.msra.gmra.mrb[28].mxu0 %vm66_vm1, %v1043_v49 }
 0xb32   :  { %v1103_v3 = vpop.f32.mrb[28].mxu0 }
 0xb33   :  { %v1104_v51 = vadd.f32 %v1103_v3, %v1053_v42  ;;  %v1372_v52 = vpop.f32.mrb[29].mxu0 }
 0xb34   :  { %v1106_v10 = vpop.f32.mrb[30].mxu0 }
 0xb35   :  { %v1112_v53 = vmul.f32 0.70710677, %v1104_v51  ;;  %v1107_v58 = vadd.f32 %v1106_v10, %v1053_v42  ;;  %v1373_v59 = vpop.f32.mrb[31].mxu0  ;;  %v1110_v12 = vmul.f32 0.5, %v1104_v51 }
 0xb37   :  { %1484 = verf.f32 %v1112_v53  ;;  %v1113_v62 = vmul.f32 0.70710677, %v1107_v58  ;;  %v1111_v48 = vmul.f32 0.5, %v1107_v58 }
 0xb39   :  { %1486 = verf.f32 %v1113_v62 }
 0xb41   :  { %v1485_v63 = vpop.eup %1484 }
 0xb42   :  { %v1116_v11 = vadd.f32 1.0, %v1485_v63 }
 0xb43   :  { %v1487_v0 = vpop.eup %1486 }
 0xb44   :  { %v1117_v4 = vadd.f32 1.0, %v1487_v0  ;;  %v1118_v6 = vmul.f32 %v1116_v11, %v1110_v12 }
 0xb46   :  { %v1119_v8 = vmul.f32 %v1117_v4, %v1111_v48 }
 0xb48   :  { %v1120_v9 = vpack.c.bf16 %v1119_v8, %v1118_v6 }
 0xb4a   :  { %1379 = vmatmul.mubr.bf16.vlgmr.msra.gmra.mrb[16].mxu1 %v1120_v9 }
 0xc1d   :  { %v1175_v20 = vpop.f32.mrb[16].mxu1 }
 0xc1e   :  { %v1176_v13 = vadd.f32 %v1175_v20, %v1128_v5  ;;  %v1380_v21 = vpop.f32.mrb[17].mxu1 }
 0xc1f   :  { %v1178_v16 = vpop.f32.mrb[18].mxu1 }
 0xc20   :  { %v1182_v18 = vadd.f32 %v1176_v13, %v1846_v1  ;;  %v1179_v25 = vadd.f32 %v1178_v16, %v1128_v5  ;;  %v1381_v24 = vpop.f32.mrb[19].mxu1 }
 0xc22   :  { %1184 = vst.msk [vmem:[#allocation7] sm:$0xff] %vm66_vm1, %v1182_v18  ;;  %v1183_v26 = vadd.f32 %v1179_v25, %v1849_v2 }
 0xc24   :  { %1185 = vst.msk [vmem:[#allocation7 + $0x8] sm:$0xff] %vm66_vm1, %v1183_v26 }
 0xc25   :  { %1543 = shalt.err (!%p1540_p6)
}
 0xc26   :  { %s1544_s17 = scalar_lea.hbm %s1889_s2, 256 }
 0xc27   :  { %p1545_p7 = scmp.ne.s32.totalorder %s1889_s2, %s1544_s17  ;;  %p1548_p8 = scmp.lt.u32.totalorder %s1544_s17, %s1889_s2 }
 0xc29   :  { %p1550_p9 = pnand %p1548_p8, %p1545_p7 }
 0xc2b   :  { %1553 = shalt.err (!%p1550_p9)
}
 0xc2c   :  { %1197 = dma.vmem_to_hbm [thread:$0]  %s1192_s13, 256, %s1889_s2, [#allocation4], %s1561_s19, %s1561_s19, %s1562_s20  }
 0xc2d   :  { %1558 = dma.done.wait [#allocation4], 256  }
 0xc2e   :  { %1559 = vsyncadd [#allocation4], 4294967040 }
 0xc2f   :  { %1201 = vsyncpa [#allocation3], 1 }
 0xc30   :  { %1202 = vsyncpa [#allocation6], 1 }
 0xc31   :  { %1203 = vsyncpa [#allocation4], 1 }

</bundles_post_ra>
